<compile_context>
chip_gen: v7x
topology: tpu7x:2x2x1
jax: 0.10.0
libtpu: 0.0.40
codegen_flags: <defaults>
</compile_context>

<pallas_src>
import jax
import jax.numpy as jnp
from jax.experimental import pallas as pl
from jax.experimental.pallas import tpu as pltpu

TB = 128          # batch tile (rows per grid step)
OUT_PAD = 128     # last-layer lane padding (real n_actions = 6)


def dqn_kernel(x_ref,
               w1_ref, b1_ref,
               w2_ref, b2_ref,
               w3_ref, b3_ref,
               w4_ref, b4_ref,
               w5p_ref, b5p_ref,
               o_ref):
    x = x_ref[...]          # [TB, 4] f32
    w1 = w1_ref[...]        # [4, 128]

    # Layer 1: K=4 contraction as 4 broadcast FMAs on the VPU (avoids a padded MXU pass).
    h = (x[:, 0:1] * w1[0:1, :]
         + x[:, 1:2] * w1[1:2, :]
         + x[:, 2:3] * w1[2:3, :]
         + x[:, 3:4] * w1[3:4, :]
         + b1_ref[...])
    h = jnp.maximum(h, 0.0)

    # Layers 2-4: MXU matmuls with f32 accumulation + ReLU.
    h = jnp.maximum(
        jnp.dot(h, w2_ref[...], preferred_element_type=jnp.float32) + b2_ref[...], 0.0)
    h = jnp.maximum(
        jnp.dot(h, w3_ref[...], preferred_element_type=jnp.float32) + b3_ref[...], 0.0)
    h = jnp.maximum(
        jnp.dot(h, w4_ref[...], preferred_element_type=jnp.float32) + b4_ref[...], 0.0)

    # Layer 5: lane-padded output (columns 6..127 are zeros from the padded weights),
    # giving an unmasked, lane-dense store.
    o_ref[...] = (jnp.dot(h, w5p_ref[...], preferred_element_type=jnp.float32)
                  + b5p_ref[...])


def dqn_forward(x, params):
    """x: [B, 4] float32. params: list of (W[in,out], b[1,out]) for 5 layers."""
    batch, in_dim = x.shape
    (w1, b1), (w2, b2), (w3, b3), (w4, b4), (w5, b5) = params
    n_out = w5.shape[1]

    # Pad the final layer out to 128 lanes for lane-dense stores.
    w5p = jnp.zeros((w5.shape[0], OUT_PAD), jnp.float32).at[:, :n_out].set(w5)
    b5p = jnp.zeros((1, OUT_PAD), jnp.float32).at[:, :n_out].set(b5)

    # Pad batch up to a multiple of TB so each grid step is a full MXU tile.
    bp = ((batch + TB - 1) // TB) * TB
    if bp != batch:
        x = jnp.pad(x, ((0, bp - batch), (0, 0)))

    flat = [x, w1, b1, w2, b2, w3, b3, w4, b4, w5p, b5p]

    def const_spec(a):
        # Full-array tile, pinned in VMEM across all grid steps.
        return pl.BlockSpec(a.shape, lambda i: (0, 0))

    out = pl.pallas_call(
        dqn_kernel,
        out_shape=jax.ShapeDtypeStruct((bp, OUT_PAD), jnp.float32),
        grid=(bp // TB,),
        in_specs=[pl.BlockSpec((TB, in_dim), lambda i: (i, 0))]
                 + [const_spec(a) for a in flat[1:]],
        out_specs=pl.BlockSpec((TB, OUT_PAD), lambda i: (i, 0)),
        compiler_params=pltpu.CompilerParams(
            dimension_semantics=("parallel",)),
    )(*flat)

    return out[:batch, :n_out]


def init_linear(key, fan_in, fan_out):
    # Deterministic init mimicking torch.nn.Linear default (uniform +/- 1/sqrt(fan_in)).
    kw, kb = jax.random.split(key)
    bound = 1.0 / jnp.sqrt(jnp.float32(fan_in))
    w = jax.random.uniform(kw, (fan_in, fan_out), jnp.float32, -bound, bound)
    b = jax.random.uniform(kb, (1, fan_out), jnp.float32, -bound, bound)
    return w, b


def init_dqn_params(key):
    dims = [(4, 128), (128, 256), (256, 256), (256, 128), (128, 6)]
    keys = jax.random.split(key, len(dims))
    return [init_linear(k, fi, fo) for k, (fi, fo) in zip(keys, dims)]


def dqn_reference(x, params):
    h = x
    for i, (w, b) in enumerate(params):
        h = h @ w + b
        if i < len(params) - 1:
            h = jnp.maximum(h, 0.0)
    return h


if __name__ == "__main__":
    key = jax.random.PRNGKey(0)
    pkey, xkey = jax.random.split(key)

    params = init_dqn_params(pkey)

    # Synthetic decoded Taxi states: [batch, 4] float32
    # (taxi_row, taxi_col, pass_idx, dest_idx). Small batch; kernel pads to TB=128.
    batch = 8
    x = jax.random.randint(xkey, (batch, 4), 0, 5).astype(jnp.float32)

    out = jax.jit(dqn_forward)(x, params)
    out = jax.block_until_ready(out)

    ref = dqn_reference(x, params)
    assert out.shape == (batch, 6)
    assert jnp.allclose(out, ref, atol=1e-4, rtol=1e-4)

    # TODO(synk): sample_action's epsilon-greedy branch and TaxiEnv.decode are
    # host-side control logic, not kernel work; only the forward pass is kerneled.
    print("KERNEL_OK")
</pallas_src>

<mosaic_0001>
module attributes {stable_mosaic.version = 11 : i64} {
  func.func @dqn_kernel(%arg0: i32, %arg1: memref<128x4xf32, #tpu.memory_space<vmem>>, %arg2: memref<4x128xf32, #tpu.memory_space<vmem>>, %arg3: memref<1x128xf32, #tpu.memory_space<vmem>>, %arg4: memref<128x256xf32, #tpu.memory_space<vmem>>, %arg5: memref<1x256xf32, #tpu.memory_space<vmem>>, %arg6: memref<256x256xf32, #tpu.memory_space<vmem>>, %arg7: memref<1x256xf32, #tpu.memory_space<vmem>>, %arg8: memref<256x128xf32, #tpu.memory_space<vmem>>, %arg9: memref<1x128xf32, #tpu.memory_space<vmem>>, %arg10: memref<128x128xf32, #tpu.memory_space<vmem>>, %arg11: memref<1x128xf32, #tpu.memory_space<vmem>>, %arg12: memref<128x128xf32, #tpu.memory_space<vmem>>) attributes {dimension_semantics = [#tpu.dimension_semantics<parallel>], iteration_bounds = array<i64: 1>, scalar_prefetch = 0 : i64, scratch_operands = 0 : i64, tpu.core_type = #tpu.core_type<tc>, window_params = [{transform_indices = @transform_0, window_bounds = array<i64: 128, 4>}, {pipeline_mode = #tpu.pipeline_mode<synchronous>, transform_indices = @transform_1, window_bounds = array<i64: 4, 128>}, {pipeline_mode = #tpu.pipeline_mode<synchronous>, transform_indices = @transform_2, window_bounds = array<i64: 1, 128>}, {pipeline_mode = #tpu.pipeline_mode<synchronous>, transform_indices = @transform_3, window_bounds = array<i64: 128, 256>}, {pipeline_mode = #tpu.pipeline_mode<synchronous>, transform_indices = @transform_4, window_bounds = array<i64: 1, 256>}, {pipeline_mode = #tpu.pipeline_mode<synchronous>, transform_indices = @transform_5, window_bounds = array<i64: 256, 256>}, {pipeline_mode = #tpu.pipeline_mode<synchronous>, transform_indices = @transform_6, window_bounds = array<i64: 1, 256>}, {pipeline_mode = #tpu.pipeline_mode<synchronous>, transform_indices = @transform_7, window_bounds = array<i64: 256, 128>}, {pipeline_mode = #tpu.pipeline_mode<synchronous>, transform_indices = @transform_8, window_bounds = array<i64: 1, 128>}, {pipeline_mode = #tpu.pipeline_mode<synchronous>, transform_indices = @transform_9, window_bounds = array<i64: 128, 128>}, {pipeline_mode = #tpu.pipeline_mode<synchronous>, transform_indices = @transform_10, window_bounds = array<i64: 1, 128>}, {transform_indices = @transform_11, window_bounds = array<i64: 128, 128>}]} {
    %c0 = arith.constant 0 : index
    %c0_0 = arith.constant 0 : index
    %0 = vector.load %arg1[%c0, %c0_0] : memref<128x4xf32, #tpu.memory_space<vmem>>, vector<128x4xf32>
    %c0_1 = arith.constant 0 : index
    %c0_2 = arith.constant 0 : index
    %1 = vector.load %arg2[%c0_1, %c0_2] : memref<4x128xf32, #tpu.memory_space<vmem>>, vector<4x128xf32>
    %2 = vector.extract_strided_slice %0 {offsets = [0, 0], sizes = [128, 1], strides = [1, 1]} : vector<128x4xf32> to vector<128x1xf32>
    %3 = vector.extract_strided_slice %1 {offsets = [0, 0], sizes = [1, 128], strides = [1, 1]} : vector<4x128xf32> to vector<1x128xf32>
    %4 = vector.broadcast %2 : vector<128x1xf32> to vector<128x128xf32>
    %5 = vector.broadcast %3 : vector<1x128xf32> to vector<128x128xf32>
    %6 = arith.mulf %4, %5 : vector<128x128xf32>
    %7 = vector.extract_strided_slice %0 {offsets = [0, 1], sizes = [128, 1], strides = [1, 1]} : vector<128x4xf32> to vector<128x1xf32>
    %8 = vector.extract_strided_slice %1 {offsets = [1, 0], sizes = [1, 128], strides = [1, 1]} : vector<4x128xf32> to vector<1x128xf32>
    %9 = vector.broadcast %7 : vector<128x1xf32> to vector<128x128xf32>
    %10 = vector.broadcast %8 : vector<1x128xf32> to vector<128x128xf32>
    %11 = arith.mulf %9, %10 : vector<128x128xf32>
    %12 = arith.addf %6, %11 : vector<128x128xf32>
    %13 = vector.extract_strided_slice %0 {offsets = [0, 2], sizes = [128, 1], strides = [1, 1]} : vector<128x4xf32> to vector<128x1xf32>
    %14 = vector.extract_strided_slice %1 {offsets = [2, 0], sizes = [1, 128], strides = [1, 1]} : vector<4x128xf32> to vector<1x128xf32>
    %15 = vector.broadcast %13 : vector<128x1xf32> to vector<128x128xf32>
    %16 = vector.broadcast %14 : vector<1x128xf32> to vector<128x128xf32>
    %17 = arith.mulf %15, %16 : vector<128x128xf32>
    %18 = arith.addf %12, %17 : vector<128x128xf32>
    %19 = vector.extract_strided_slice %0 {offsets = [0, 3], sizes = [128, 1], strides = [1, 1]} : vector<128x4xf32> to vector<128x1xf32>
    %20 = vector.extract_strided_slice %1 {offsets = [3, 0], sizes = [1, 128], strides = [1, 1]} : vector<4x128xf32> to vector<1x128xf32>
    %21 = vector.broadcast %19 : vector<128x1xf32> to vector<128x128xf32>
    %22 = vector.broadcast %20 : vector<1x128xf32> to vector<128x128xf32>
    %23 = arith.mulf %21, %22 : vector<128x128xf32>
    %24 = arith.addf %18, %23 : vector<128x128xf32>
    %c0_3 = arith.constant 0 : index
    %c0_4 = arith.constant 0 : index
    %25 = vector.load %arg3[%c0_3, %c0_4] : memref<1x128xf32, #tpu.memory_space<vmem>>, vector<1x128xf32>
    %26 = vector.broadcast %25 : vector<1x128xf32> to vector<128x128xf32>
    %27 = arith.addf %24, %26 : vector<128x128xf32>
    %cst = arith.constant 0.000000e+00 : f32
    %28 = vector.broadcast %cst : f32 to vector<128x128xf32>
    %29 = arith.maximumf %27, %28 : vector<128x128xf32>
    %c0_5 = arith.constant 0 : index
    %c0_6 = arith.constant 0 : index
    %30 = vector.load %arg4[%c0_5, %c0_6] : memref<128x256xf32, #tpu.memory_space<vmem>>, vector<128x256xf32>
    %cst_7 = arith.constant dense<0.000000e+00> : vector<128x256xf32>
    %31 = tpu.matmul %29, %30, %cst_7 {dimension_numbers = #tpu.dot_dimension_numbers<[1], [0], [0], [1], [0, 0, 1, 1], [], []>} : vector<128x128xf32>, vector<128x256xf32>, vector<128x256xf32> -> vector<128x256xf32>
    %c0_8 = arith.constant 0 : index
    %c0_9 = arith.constant 0 : index
    %32 = vector.load %arg5[%c0_8, %c0_9] : memref<1x256xf32, #tpu.memory_space<vmem>>, vector<1x256xf32>
    %33 = vector.broadcast %32 : vector<1x256xf32> to vector<128x256xf32>
    %34 = arith.addf %31, %33 : vector<128x256xf32>
    %cst_10 = arith.constant 0.000000e+00 : f32
    %35 = vector.broadcast %cst_10 : f32 to vector<128x256xf32>
    %36 = arith.maximumf %34, %35 : vector<128x256xf32>
    %c0_11 = arith.constant 0 : index
    %c0_12 = arith.constant 0 : index
    %37 = vector.load %arg6[%c0_11, %c0_12] : memref<256x256xf32, #tpu.memory_space<vmem>>, vector<256x256xf32>
    %cst_13 = arith.constant dense<0.000000e+00> : vector<128x256xf32>
    %38 = tpu.matmul %36, %37, %cst_13 {dimension_numbers = #tpu.dot_dimension_numbers<[1], [0], [0], [1], [0, 0, 1, 1], [], []>} : vector<128x256xf32>, vector<256x256xf32>, vector<128x256xf32> -> vector<128x256xf32>
    %c0_14 = arith.constant 0 : index
    %c0_15 = arith.constant 0 : index
    %39 = vector.load %arg7[%c0_14, %c0_15] : memref<1x256xf32, #tpu.memory_space<vmem>>, vector<1x256xf32>
    %40 = vector.broadcast %39 : vector<1x256xf32> to vector<128x256xf32>
    %41 = arith.addf %38, %40 : vector<128x256xf32>
    %cst_16 = arith.constant 0.000000e+00 : f32
    %42 = vector.broadcast %cst_16 : f32 to vector<128x256xf32>
    %43 = arith.maximumf %41, %42 : vector<128x256xf32>
    %c0_17 = arith.constant 0 : index
    %c0_18 = arith.constant 0 : index
    %44 = vector.load %arg8[%c0_17, %c0_18] : memref<256x128xf32, #tpu.memory_space<vmem>>, vector<256x128xf32>
    %cst_19 = arith.constant dense<0.000000e+00> : vector<128x128xf32>
    %45 = tpu.matmul %43, %44, %cst_19 {dimension_numbers = #tpu.dot_dimension_numbers<[1], [0], [0], [1], [0, 0, 1, 1], [], []>} : vector<128x256xf32>, vector<256x128xf32>, vector<128x128xf32> -> vector<128x128xf32>
    %c0_20 = arith.constant 0 : index
    %c0_21 = arith.constant 0 : index
    %46 = vector.load %arg9[%c0_20, %c0_21] : memref<1x128xf32, #tpu.memory_space<vmem>>, vector<1x128xf32>
    %47 = vector.broadcast %46 : vector<1x128xf32> to vector<128x128xf32>
    %48 = arith.addf %45, %47 : vector<128x128xf32>
    %cst_22 = arith.constant 0.000000e+00 : f32
    %49 = vector.broadcast %cst_22 : f32 to vector<128x128xf32>
    %50 = arith.maximumf %48, %49 : vector<128x128xf32>
    %c0_23 = arith.constant 0 : index
    %c0_24 = arith.constant 0 : index
    %51 = vector.load %arg10[%c0_23, %c0_24] : memref<128x128xf32, #tpu.memory_space<vmem>>, vector<128x128xf32>
    %cst_25 = arith.constant dense<0.000000e+00> : vector<128x128xf32>
    %52 = tpu.matmul %50, %51, %cst_25 {dimension_numbers = #tpu.dot_dimension_numbers<[1], [0], [0], [1], [0, 0, 1, 1], [], []>} : vector<128x128xf32>, vector<128x128xf32>, vector<128x128xf32> -> vector<128x128xf32>
    %c0_26 = arith.constant 0 : index
    %c0_27 = arith.constant 0 : index
    %53 = vector.load %arg11[%c0_26, %c0_27] : memref<1x128xf32, #tpu.memory_space<vmem>>, vector<1x128xf32>
    %54 = vector.broadcast %53 : vector<1x128xf32> to vector<128x128xf32>
    %55 = arith.addf %52, %54 : vector<128x128xf32>
    %c0_28 = arith.constant 0 : index
    %c0_29 = arith.constant 0 : index
    %56 = vector.load %arg12[%c0_28, %c0_29] : memref<128x128xf32, #tpu.memory_space<vmem>>, vector<128x128xf32>
    tpu.vector_store %arg12[%c0_28, %c0_29], %55 {strides = array<i32>} : memref<128x128xf32, #tpu.memory_space<vmem>>, vector<128x128xf32>,
    return
  }
  func.func @transform_0(%arg0: i32) -> (i32, i32) {
    %c0_i32 = arith.constant 0 : i32
    %c0_i32_0 = arith.constant 0 : i32
    return %arg0, %c0_i32 : i32, i32
  }
  func.func @transform_1(%arg0: i32) -> (i32, i32) {
    %c0_i32 = arith.constant 0 : i32
    %c0_i32_0 = arith.constant 0 : i32
    %c0_i32_1 = arith.constant 0 : i32
    return %c0_i32, %c0_i32_0 : i32, i32
  }
  func.func @transform_2(%arg0: i32) -> (i32, i32) {
    %c0_i32 = arith.constant 0 : i32
    %c0_i32_0 = arith.constant 0 : i32
    %c0_i32_1 = arith.constant 0 : i32
    return %c0_i32, %c0_i32_0 : i32, i32
  }
  func.func @transform_3(%arg0: i32) -> (i32, i32) {
    %c0_i32 = arith.constant 0 : i32
    %c0_i32_0 = arith.constant 0 : i32
    %c0_i32_1 = arith.constant 0 : i32
    return %c0_i32, %c0_i32_0 : i32, i32
  }
  func.func @transform_4(%arg0: i32) -> (i32, i32) {
    %c0_i32 = arith.constant 0 : i32
    %c0_i32_0 = arith.constant 0 : i32
    %c0_i32_1 = arith.constant 0 : i32
    return %c0_i32, %c0_i32_0 : i32, i32
  }
  func.func @transform_5(%arg0: i32) -> (i32, i32) {
    %c0_i32 = arith.constant 0 : i32
    %c0_i32_0 = arith.constant 0 : i32
    %c0_i32_1 = arith.constant 0 : i32
    return %c0_i32, %c0_i32_0 : i32, i32
  }
  func.func @transform_6(%arg0: i32) -> (i32, i32) {
    %c0_i32 = arith.constant 0 : i32
    %c0_i32_0 = arith.constant 0 : i32
    %c0_i32_1 = arith.constant 0 : i32
    return %c0_i32, %c0_i32_0 : i32, i32
  }
  func.func @transform_7(%arg0: i32) -> (i32, i32) {
    %c0_i32 = arith.constant 0 : i32
    %c0_i32_0 = arith.constant 0 : i32
    %c0_i32_1 = arith.constant 0 : i32
    return %c0_i32, %c0_i32_0 : i32, i32
  }
  func.func @transform_8(%arg0: i32) -> (i32, i32) {
    %c0_i32 = arith.constant 0 : i32
    %c0_i32_0 = arith.constant 0 : i32
    %c0_i32_1 = arith.constant 0 : i32
    return %c0_i32, %c0_i32_0 : i32, i32
  }
  func.func @transform_9(%arg0: i32) -> (i32, i32) {
    %c0_i32 = arith.constant 0 : i32
    %c0_i32_0 = arith.constant 0 : i32
    %c0_i32_1 = arith.constant 0 : i32
    return %c0_i32, %c0_i32_0 : i32, i32
  }
  func.func @transform_10(%arg0: i32) -> (i32, i32) {
    %c0_i32 = arith.constant 0 : i32
    %c0_i32_0 = arith.constant 0 : i32
    %c0_i32_1 = arith.constant 0 : i32
    return %c0_i32, %c0_i32_0 : i32, i32
  }
  func.func @transform_11(%arg0: i32) -> (i32, i32) {
    %c0_i32 = arith.constant 0 : i32
    %c0_i32_0 = arith.constant 0 : i32
    return %arg0, %c0_i32 : i32, i32
  }
}

</mosaic_0001>

<bundles_post_ra>
// kernel: dqn_forward.1
= control target key start
LH: loop header
LB: loop body
LE: loop exit
PB: predicated region body
PF: predicated region fallthrough
CT: control target
= control target key end

     0   :  { %16 = vsyncpa [#allocation3], 0  ;;  %s1816_s17 = smov [#allocation2]   ;;  %s2686_s0 = inlined_call_operand.vmem [shape: f32[128,4], index: 0, kind: input, shape index: {}]   ;;  %s2687_s1 = inlined_call_operand.vmem [shape: f32[4,128], index: 1, kind: input, shape index: {}]   ;;  %s2688_s2 = inlined_call_operand.vmem [shape: f32[1,128], index: 2, kind: input, shape index: {}]   ;;  %s2689_s3 = inlined_call_operand.vmem [shape: f32[128,256], index: 3, kind: input, shape index: {}]   ;;  %s2690_s4 = inlined_call_operand.vmem [shape: f32[1,256], index: 4, kind: input, shape index: {}]   ;;  %s2691_s5 = inlined_call_operand.vmem [shape: f32[256,256], index: 5, kind: input, shape index: {}]   ;;  %s2692_s6 = inlined_call_operand.vmem [shape: f32[1,256], index: 6, kind: input, shape index: {}]   ;;  %s2693_s7 = inlined_call_operand.hbm [shape: f32[256,128], index: 7, kind: input, shape index: {}]   ;;  %s2694_s8 = inlined_call_operand.vmem [shape: f32[1,128], index: 8, kind: input, shape index: {}]   ;;  %s2695_s9 = inlined_call_operand.vmem [shape: f32[128,128], index: 9, kind: input, shape index: {}]   ;;  %s2696_s10 = inlined_call_operand.vmem [shape: f32[1,128], index: 10, kind: input, shape index: {}]   ;;  %s2697_s11 = inlined_call_operand.vmem [shape: f32[128,128], index: 11, kind: output, shape index: {}]  }
   0x1   :  { %s36_s18 = sshll.u32 %s1816_s17, 4  ;;  %s1792_s21 = scalar_lea.hbm %s2693_s7, 4096  ;;  %s37_s18 = int_to_ptr.vmem [resolvable:$true] %s36_s18 }
   0x2   :  { %p1793_p0 = scmp.ne.s32.totalorder %s2693_s7, %s1792_s21  ;;  %p1796_p1 = scmp.lt.u32.totalorder %s1792_s21, %s2693_s7 }
   0x4   :  { %p1798_p2 = pnand %p1796_p1, %p1793_p0 }
   0x6   :  { %1801 = shalt.err (!%p1798_p2)
}
   0x7   :  { %s1802_s26 = scalar_lea.vmem %s37_s18, 4096  ;;  %p1807_p4 = scmp.lt.s32.totalorder %s37_s18, %s37_s18 }
   0x8   :  { %p1803_p3 = scmp.ne.s32.totalorder %s37_s18, %s1802_s26  ;;  %p1808_p5 = scmp.lt.s32.totalorder %s1802_s26, %s1802_s26 }
   0xa   :  { %p1809_p6 = por %p1808_p5, %p1807_p4 }
   0xc   :  { %p1810_p7 = pnand %p1809_p6, %p1803_p3 }
   0xe   :  { %1813 = shalt.err (!%p1810_p7)
}
   0xf   :  { %s1817_s27 = smov 128   ;;  %s1818_s28 = smov 8  }
  0x10   :  { %42 = dma.hbm_to_vmem [thread:$0]  %s2693_s7, 4096, %s37_s18, [#allocation3], %s1817_s27, %s1817_s27, %s1818_s28  }
  0x11   :  { %1814 = dma.done.wait [#allocation3], 4096  }
  0x12   :  { %1815 = vsyncadd [#allocation3], 4294963200  ;;  %v1819_v0 = vmov 3   ;;  %v1820_v1 = vmov 2   ;;  %v1901_v2 = vld [vmem:[%s2686_s0] sm:$0xff]  ;;  %v1908_v3 = vld [vmem:[%s2686_s0 + $0x18] sm:$0xff] }
  0x13   :  { %1745 = vset.pattern.permute.xlu0 %v1819_v0  ;;  %1742 = vset.pattern.permute.xlu1 %v1820_v1  ;;  %v1913_v4 = vld [vmem:[%s2686_s0 + $0x8] sm:$0xff]  ;;  %v511_v6 = vld [vmem:[%s2689_s3 + $0x18] sm:$0xff]  ;;  %v1821_v7 = vmov 0   ;;  %v508_v8 = vld [vmem:[%s2689_s3] sm:$0xff]  ;;  %v1822_v14 = vmov 1   ;;  %v1823_v60 = vmov 0.0  }
  0x14   :  { %370 = vperm.xlu0 %1745, %v1901_v2   ;;  %270 = vperm.xlu1 %1742, %v1901_v2   ;;  %v509_v5 = vld [vmem:[%s2689_s3 + $0x8] sm:$0xff]  ;;  %v510_v9 = vld [vmem:[%s2689_s3 + $0x10] sm:$0xff]  ;;  %v515_v13 = vld [vmem:[%s2689_s3 + $0x38] sm:$0xff] }
  0x15   :  { %v1574_v10 = vpack.c.bf16 %v511_v6, %v509_v5  ;;  %v1576_v11 = vpack.c.bf16 %v510_v9, %v508_v8  ;;  %v513_v12 = vld [vmem:[%s2689_s3 + $0x28] sm:$0xff]  ;;  %v512_v16 = vld [vmem:[%s2689_s3 + $0x20] sm:$0xff]  ;;  %v514_v17 = vld [vmem:[%s2689_s3 + $0x30] sm:$0xff]  ;;  %616 = vmatprep.mubr.f32.mxu0 %v1823_v60 }
  0x16   :  { %v1578_v15 = vpack.c.bf16 %v515_v13, %v513_v12  ;;  %v1580_v18 = vpack.c.bf16 %v514_v17, %v512_v16  ;;  %v1949_v19 = vld [vmem:[%s2686_s0 + $0x10] sm:$0xff]  ;;  %v517_v20 = vld [vmem:[%s2689_s3 + $0x48] sm:$0xff]  ;;  %v519_v21 = vld [vmem:[%s2689_s3 + $0x58] sm:$0xff]  ;;  %v149_v13 = vlaneseq }
  0x17   :  { %1575 = vmatprep.subr.bf16.mxu0 %v1574_v10  ;;  %v1582_v22 = vpack.c.bf16 %v519_v21, %v517_v20  ;;  %v516_v23 = vld [vmem:[%s2689_s3 + $0x40] sm:$0xff]  ;;  %v518_v24 = vld [vmem:[%s2689_s3 + $0x50] sm:$0xff]  ;;  %v1968_v26 = vld [vmem:[%s2686_s0 + $0x28] sm:$0xff] }
  0x18   :  { %382 = vperm.xlu0 %1745, %v1908_v3   ;;  %1743 = vset.pattern.permute.xlu1 %v1821_v7  ;;  %v1584_v25 = vpack.c.bf16 %v518_v24, %v516_v23  ;;  %v521_v27 = vld [vmem:[%s2689_s3 + $0x68] sm:$0xff]  ;;  %v523_v28 = vld [vmem:[%s2689_s3 + $0x78] sm:$0xff]  ;;  %v520_v30 = vld [vmem:[%s2689_s3 + $0x60] sm:$0xff]  ;;  %v150_v16 = vshrl.u32 %v149_v13, 7 }
  0x19   :  { %76 = vperm.xlu1 %1743, %v1913_v4   ;;  %1577 = vmatpush1.bf16.msra.mxu0 %v1576_v11  ;;  %v1586_v29 = vpack.c.bf16 %v523_v28, %v521_v27  ;;  %v522_v31 = vld [vmem:[%s2689_s3 + $0x70] sm:$0xff]  ;;  %v1987_v33 = vld [vmem:[%s2686_s0 + $0x40] sm:$0xff]  ;;  %v525_v34 = vld [vmem:[%s2689_s3 + $0x88] sm:$0xff] }
  0x1a   :  { %1579 = vmatprep.subr.bf16.mxu0 %v1578_v15  ;;  %v1588_v32 = vpack.c.bf16 %v522_v31, %v520_v30  ;;  %v527_v35 = vld [vmem:[%s2689_s3 + $0x98] sm:$0xff]  ;;  %v524_v37 = vld [vmem:[%s2689_s3 + $0x80] sm:$0xff]  ;;  %v526_v38 = vld [vmem:[%s2689_s3 + $0x90] sm:$0xff]  ;;  %v2135_v20 = vsub.s32 0, %v150_v16  ;;  %v435_v24 = vsub.s32 3, %v150_v16 }
  0x1b   :  { %v1590_v36 = vpack.c.bf16 %v527_v35, %v525_v34  ;;  %v1592_v39 = vpack.c.bf16 %v526_v38, %v524_v37  ;;  %v529_v40 = vld [vmem:[%s2689_s3 + $0xa8] sm:$0xff]  ;;  %v531_v41 = vld [vmem:[%s2689_s3 + $0xb8] sm:$0xff]  ;;  %v528_v43 = vld [vmem:[%s2689_s3 + $0xa0] sm:$0xff] }
  0x1c   :  { %1754 = vset.pattern.permute.xlu0 %v1822_v14  ;;  %v1594_v42 = vpack.c.bf16 %v531_v41, %v529_v40  ;;  %v530_v44 = vld [vmem:[%s2689_s3 + $0xb0] sm:$0xff]  ;;  %v533_v46 = vld [vmem:[%s2689_s3 + $0xc8] sm:$0xff]  ;;  %v535_v47 = vld [vmem:[%s2689_s3 + $0xd8] sm:$0xff] }
  0x1d   :  { %170 = vperm.xlu0 %1754, %v1901_v2   ;;  %1744 = vset.pattern.permute.xlu1 %v1822_v14  ;;  %v1596_v45 = vpack.c.bf16 %v530_v44, %v528_v43  ;;  %v1598_v48 = vpack.c.bf16 %v535_v47, %v533_v46  ;;  %v532_v49 = vld [vmem:[%s2689_s3 + $0xc0] sm:$0xff]  ;;  %v534_v50 = vld [vmem:[%s2689_s3 + $0xd0] sm:$0xff]  ;;  %v537_v53 = vld [vmem:[%s2689_s3 + $0xe8] sm:$0xff] }
  0x1e   :  { %174 = vperm.xlu1 %1744, %v1913_v4   ;;  %1581 = vmatpush1.bf16.msra.mxu0 %v1580_v18  ;;  %v1600_v51 = vpack.c.bf16 %v534_v50, %v532_v49  ;;  %v58_v52 = vld [vmem:[%s2686_s0 + $0x30] sm:$0xff]  ;;  %v539_v54 = vld [vmem:[%s2689_s3 + $0xf8] sm:$0xff]  ;;  %v536_v56 = vld [vmem:[%s2689_s3 + $0xe0] sm:$0xff]  ;;  %v2130_v18 = vsub.s32 1, %v150_v16 }
  0x1f   :  { %1583 = vmatprep.subr.bf16.mxu0 %v1582_v22  ;;  %v1602_v55 = vpack.c.bf16 %v539_v54, %v537_v53  ;;  %v538_v57 = vld [vmem:[%s2689_s3 + $0xf0] sm:$0xff]  ;;  %v61_v59 = vld [vmem:[%s2686_s0 + $0x48] sm:$0xff]  ;;  %v2060_v61 = vld [vmem:[%s2686_s0 + $0x60] sm:$0xff]  ;;  %v335_v22 = vsub.s32 2, %v150_v16 }
  0x20   :  { %v1604_v58 = vpack.c.bf16 %v538_v57, %v536_v56  ;;  %v56_v62 = vld [vmem:[%s2686_s0 + $0x20] sm:$0xff]  ;;  %v2084_v63 = vld [vmem:[%s2686_s0 + $0x58] sm:$0xff]  ;;  %v62_v5 = vld [vmem:[%s2686_s0 + $0x50] sm:$0xff] }
  0x21   :  { %178 = vperm.xlu0 %1754, %v1949_v19   ;;  %v68_v21 = vld [vmem:[%s2687_s1] sm:$0xf]  ;;  %v65_v53 = vld [vmem:[%s2686_s0 + $0x68] sm:$0xff] }
  0x22   :  { %1746 = vset.pattern.permute.xlu1 %v1820_v1  ;;  %1585 = vmatpush1.bf16.msra.mxu0 %v1584_v25  ;;  %v2141_v25 = vrot.slane %v68_v21, %v2130_v18  ;;  %v2147_v27 = vrot.slane %v68_v21, %v2135_v20  ;;  %v2150_v28 = vrot.slane %v68_v21, %v335_v22  ;;  %v2171_v49 = vld [vmem:[%s2688_s2] ss:$0 sm:$0xff] }
  0x23   :  { %274 = vperm.xlu1 %1746, %v1913_v4   ;;  %1587 = vmatprep.subr.bf16.mxu0 %v1586_v29  ;;  %v2152_v29 = vrot.slane %v68_v21, %v435_v24 }
  0x25   :  { %190 = vperm.xlu0 %1754, %v1968_v26  }
  0x26   :  { %1589 = vmatpush1.bf16.msra.mxu0 %v1588_v32 }
  0x27   :  { %1747 = vset.pattern.permute.xlu1 %v1821_v7  ;;  %1591 = vmatprep.subr.bf16.mxu0 %v1590_v36 }
  0x28   :  { %81 = vperm.xlu1 %1747, %v1949_v19  }
  0x29   :  { %202 = vperm.xlu0 %1754, %v1987_v33  }
  0x2a   :  { %1593 = vmatpush1.bf16.msra.mxu0 %v1592_v39 }
  0x2b   :  { %1595 = vmatprep.subr.bf16.mxu0 %v1594_v42 }
  0x2c   :  { %1748 = vset.pattern.permute.xlu1 %v1819_v0 }
  0x2d   :  { %1765 = vset.pattern.permute.xlu0 %v1821_v7  ;;  %374 = vperm.xlu1 %1748, %v1913_v4   ;;  %v2102_v4 = vld [vmem:[%s2686_s0 + $0x78] sm:$0xff] }
  0x2e   :  { %71 = vperm.xlu0 %1765, %v1901_v2   ;;  %1597 = vmatpush1.bf16.msra.mxu0 %v1596_v45  ;;  %v2091_v2 = vld [vmem:[%s2686_s0 + $0x70] sm:$0xff] }
  0x2f   :  { %1599 = vmatprep.subr.bf16.mxu0 %v1598_v48 }
  0x31   :  { %1749 = vset.pattern.permute.xlu1 %v1820_v1 }
  0x32   :  { %86 = vperm.xlu0 %1765, %v1908_v3   ;;  %278 = vperm.xlu1 %1749, %v1949_v19  }
  0x33   :  { %1601 = vmatpush1.bf16.msra.mxu0 %v1600_v51 }
  0x34   :  { %1603 = vmatprep.subr.bf16.mxu0 %v1602_v55 }
  0x36   :  { %101 = vperm.xlu0 %1765, %v58_v52   ;;  %1750 = vset.pattern.permute.xlu1 %v1822_v14 }
  0x37   :  { %182 = vperm.xlu1 %1750, %v1908_v3   ;;  %1605 = vmatpush1.bf16.msra.mxu0 %v1604_v58 }
  0x3a   :  { %116 = vperm.xlu0 %1765, %v61_v59  }
  0x3b   :  { %1751 = vset.pattern.permute.xlu1 %v1819_v0 }
  0x3c   :  { %378 = vperm.xlu1 %1751, %v1949_v19  }
  0x3e   :  { %131 = vperm.xlu0 %1765, %v2060_v61  }
  0x40   :  { %1752 = vset.pattern.permute.xlu1 %v1821_v7 }
  0x41   :  { %91 = vperm.xlu1 %1752, %v56_v62  }
  0x42   :  { %1776 = vset.pattern.permute.xlu0 %v1820_v1 }
  0x43   :  { %282 = vperm.xlu0 %1776, %v1908_v3   ;;  %v59_v3 = vld [vmem:[%s2686_s0 + $0x38] sm:$0xff] }
  0x45   :  { %1753 = vset.pattern.permute.xlu1 %v1822_v14 }
  0x46   :  { %186 = vperm.xlu1 %1753, %v56_v62  }
  0x47   :  { %294 = vperm.xlu0 %1776, %v58_v52  }
  0x4a   :  { %1755 = vset.pattern.permute.xlu1 %v1820_v1 }
  0x4b   :  { %286 = vperm.xlu1 %1755, %v56_v62   ;;  %306 = vperm.xlu0 %1776, %v61_v59  }
  0x4f   :  { %1756 = vset.pattern.permute.xlu1 %v1821_v7  ;;  %318 = vperm.xlu0 %1776, %v2060_v61  }
  0x50   :  { %96 = vperm.xlu1 %1756, %v1968_v26  }
  0x53   :  { %1779 = vset.pattern.permute.xlu0 %v1819_v0 }
  0x54   :  { %1757 = vset.pattern.permute.xlu1 %v1819_v0  ;;  %394 = vperm.xlu0 %1779, %v58_v52  }
  0x55   :  { %386 = vperm.xlu1 %1757, %v56_v62  }
  0x58   :  { %406 = vperm.xlu0 %1779, %v61_v59  }
  0x59   :  { %1758 = vset.pattern.permute.xlu1 %v1820_v1 }
  0x5a   :  { %290 = vperm.xlu1 %1758, %v1968_v26  }
  0x5c   :  { %418 = vperm.xlu0 %1779, %v2060_v61  }
  0x5e   :  { %1759 = vset.pattern.permute.xlu1 %v1822_v14 }
  0x5f   :  { %194 = vperm.xlu1 %1759, %v58_v52  }
  0x60   :  { %1782 = vset.pattern.permute.xlu0 %v1822_v14 }
  0x61   :  { %214 = vperm.xlu0 %1782, %v2084_v63  }
  0x63   :  { %1760 = vset.pattern.permute.xlu1 %v1819_v0 }
  0x64   :  { %390 = vperm.xlu1 %1760, %v1968_v26  }
  0x65   :  { %226 = vperm.xlu0 %1782, %v2091_v2  }
  0x68   :  { %1761 = vset.pattern.permute.xlu1 %v1821_v7 }
  0x69   :  { %106 = vperm.xlu1 %1761, %v59_v3   ;;  %1787 = vset.pattern.permute.xlu0 %v1821_v7 }
  0x6a   :  { %146 = vperm.xlu0 %1787, %v2102_v4  }
  0x6d   :  { %1762 = vset.pattern.permute.xlu1 %v1822_v14 }
  0x6e   :  { %198 = vperm.xlu1 %1762, %v59_v3   ;;  %1790 = vset.pattern.permute.xlu0 %v1820_v1 }
  0x6f   :  { %330 = vperm.xlu0 %1790, %v2102_v4  }
  0x72   :  { %1763 = vset.pattern.permute.xlu1 %v1820_v1 }
  0x73   :  { %298 = vperm.xlu1 %1763, %v59_v3   ;;  %1791 = vset.pattern.permute.xlu0 %v1819_v0 }
  0x77   :  { %1764 = vset.pattern.permute.xlu1 %v1821_v7 }
  0x78   :  { %111 = vperm.xlu1 %1764, %v1987_v33  }
  0x7c   :  { %1766 = vset.pattern.permute.xlu1 %v1819_v0 }
  0x7d   :  { %398 = vperm.xlu1 %1766, %v59_v3  }
  0x81   :  { %1767 = vset.pattern.permute.xlu1 %v1820_v1 }
  0x82   :  { %302 = vperm.xlu1 %1767, %v1987_v33  }
  0x86   :  { %1768 = vset.pattern.permute.xlu1 %v1822_v14 }
  0x87   :  { %206 = vperm.xlu1 %1768, %v61_v59  }
  0x8b   :  { %1769 = vset.pattern.permute.xlu1 %v1819_v0 }
  0x8c   :  { %402 = vperm.xlu1 %1769, %v1987_v33  }
  0x90   :  { %1770 = vset.pattern.permute.xlu1 %v1821_v7 }
  0x91   :  { %121 = vperm.xlu1 %1770, %v62_v5  }
  0x93   :  { %v271_v6 = vpop.permute.xlu1 %270  ;;  %v371_v8 = vpop.permute.xlu0 %370 }
  0x94   :  { %v337_v37 = vmul.f32 %v2150_v28, %v271_v6  ;;  %v437_v38 = vmul.f32 %v2152_v29, %v371_v8 }
  0x95   :  { %1771 = vset.pattern.permute.xlu1 %v1822_v14 }
  0x96   :  { %210 = vperm.xlu1 %1771, %v62_v5  }
  0x97   :  { %v2125_v9 = vpop.permute.xlu0 %382 }
  0x98   :  { %v77_v10 = vpop.permute.xlu1 %76  ;;  %v440_v16 = vmul.f32 %v2152_v29, %v2125_v9 }
  0x99   :  { %v154_v34 = vmul.f32 %v2147_v27, %v77_v10 }
  0x9a   :  { %1772 = vset.pattern.permute.xlu1 %v1820_v1 }
  0x9b   :  { %310 = vperm.xlu1 %1772, %v62_v5  }
  0x9c   :  { %v171_v11 = vpop.permute.xlu0 %170 }
  0x9d   :  { %v175_v12 = vpop.permute.xlu1 %174  ;;  %v237_v30 = vmul.f32 %v2141_v25, %v171_v11 }
  0x9e   :  { %v238_v31 = vmul.f32 %v2141_v25, %v175_v12 }
  0x9f   :  { %1773 = vset.pattern.permute.xlu1 %v1821_v7 }
  0xa0   :  { %126 = vperm.xlu1 %1773, %v2084_v63   ;;  %v179_v15 = vpop.permute.xlu0 %178  ;;  %v254_v39 = vadd.f32 %v238_v31, %v154_v34 }
  0xa1   :  { %v239_v50 = vmul.f32 %v2141_v25, %v179_v15 }
  0xa2   :  { %v275_v17 = vpop.permute.xlu1 %274 }
  0xa3   :  { %v338_v35 = vmul.f32 %v2150_v28, %v275_v17 }
  0xa4   :  { %1774 = vset.pattern.permute.xlu1 %v1819_v0  ;;  %v2133_v19 = vpop.permute.xlu0 %190 }
  0xa5   :  { %410 = vperm.xlu1 %1774, %v62_v5   ;;  %v354_v44 = vadd.f32 %v338_v35, %v254_v39  ;;  %v745_v39 = vld [vmem:[%s2691_s5] sm:$0xff] }
  0xa7   :  { %v82_v23 = vpop.permute.xlu1 %81 }
  0xa8   :  { %v2143_v26 = vpop.permute.xlu0 %202  ;;  %v155_v51 = vmul.f32 %v2147_v27, %v82_v23 }
  0xa9   :  { %1775 = vset.pattern.permute.xlu1 %v1820_v1 }
  0xaa   :  { %314 = vperm.xlu1 %1775, %v2084_v63   ;;  %v255_v59 = vadd.f32 %v239_v50, %v155_v51  ;;  %v749_v51 = vld [vmem:[%s2691_s5 + $0x20] sm:$0xff] }
  0xac   :  { %v375_v32 = vpop.permute.xlu1 %374 }
  0xad   :  { %v72_v33 = vpop.permute.xlu0 %71  ;;  %v438_v40 = vmul.f32 %v2152_v29, %v375_v32 }
  0xae   :  { %v153_v36 = vmul.f32 %v2147_v27, %v72_v33  ;;  %1777 = vset.pattern.permute.xlu1 %v1822_v14 }
  0xaf   :  { %218 = vperm.xlu1 %1777, %v2060_v61   ;;  %v454_v46 = vadd.f32 %v438_v40, %v354_v44  ;;  %v747_v40 = vld [vmem:[%s2691_s5 + $0x10] sm:$0xff] }
  0xb0   :  { %v253_v41 = vadd.f32 %v237_v30, %v153_v36  ;;  %v746_v36 = vld [vmem:[%s2691_s5 + $0x8] sm:$0xff] }
  0xb1   :  { %v279_v42 = vpop.permute.xlu1 %278  ;;  %v87_v43 = vpop.permute.xlu0 %86  ;;  %v477_v57 = vadd.f32 %v2171_v49, %v454_v46  ;;  %v750_v46 = vld [vmem:[%s2691_s5 + $0x28] sm:$0xff] }
  0xb2   :  { %v353_v45 = vadd.f32 %v337_v37, %v253_v41  ;;  %v339_v55 = vmul.f32 %v2150_v28, %v279_v42  ;;  %v156_v8 = vmul.f32 %v2147_v27, %v87_v43  ;;  %v748_v37 = vld [vmem:[%s2691_s5 + $0x18] sm:$0xff]  ;;  %v1608_v42 = vpack.c.bf16 %v747_v40, %v745_v39 }
  0xb3   :  { %1778 = vset.pattern.permute.xlu1 %v1819_v0  ;;  %v493_v3 = vmax.f32 %v477_v57, 0.0  ;;  %v768_v39 = vld [vmem:[%s2691_s5 + $0xb8] sm:$0xff] }
  0xb4   :  { %414 = vperm.xlu1 %1778, %v2084_v63   ;;  %v453_v47 = vadd.f32 %v437_v38, %v353_v45  ;;  %v355_v62 = vadd.f32 %v339_v55, %v255_v59  ;;  %v1606_v38 = vpack.c.bf16 %v748_v37, %v746_v36  ;;  %v756_v59 = vld [vmem:[%s2691_s5 + $0x58] sm:$0xff] }
  0xb5   :  { %v2166_v48 = vpop.permute.xlu0 %101 }
  0xb6   :  { %v183_v52 = vpop.permute.xlu1 %182  ;;  %v476_v54 = vadd.f32 %v2171_v49, %v453_v47  ;;  %1607 = vmatprep.subr.bf16.mxu1 %v1606_v38  ;;  %v752_v47 = vld [vmem:[%s2691_s5 + $0x38] sm:$0xff]  ;;  %v766_v38 = vld [vmem:[%s2691_s5 + $0xa8] sm:$0xff] }
  0xb7   :  { %v240_v10 = vmul.f32 %v2141_v25, %v183_v52  ;;  %1609 = vmatpush1.bf16.msra.mxu1 %v1608_v42  ;;  %v1610_v50 = vpack.c.bf16 %v752_v47, %v750_v46  ;;  %v751_v52 = vld [vmem:[%s2691_s5 + $0x30] sm:$0xff]  ;;  %v1626_v42 = vpack.c.bf16 %v768_v39, %v766_v38  ;;  %v789_v39 = vld [vmem:[%s2691_s5 + $0x160] sm:$0xff] }
  0xb8   :  { %1780 = vset.pattern.permute.xlu1 %v1821_v7  ;;  %v492_v56 = vmax.f32 %v476_v54, 0.0  ;;  %v1612_v54 = vpack.c.bf16 %v751_v52, %v749_v51  ;;  %v772_v51 = vld [vmem:[%s2691_s5 + $0xd8] sm:$0xff]  ;;  %v769_v52 = vld [vmem:[%s2691_s5 + $0xc0] sm:$0xff] }
  0xb9   :  { %136 = vperm.xlu1 %1780, %v65_v53   ;;  %v2182_v58 = vpop.permute.xlu0 %116  ;;  %v256_v17 = vadd.f32 %v240_v10, %v156_v8  ;;  %1611 = vmatprep.subr.bf16.mxu1 %v1610_v50  ;;  %v159_v8 = vmul.f32 %v2147_v27, %v2166_v48  ;;  %v758_v10 = vld [vmem:[%s2691_s5 + $0x68] sm:$0xff]  ;;  %v757_v48 = vld [vmem:[%s2691_s5 + $0x60] sm:$0xff] }
  0xba   :  { %617 = vmatmul.mubr.f32.vlgmr.msra.gmra.mrb[0].mxu0 %v492_v56  ;;  %v770_v50 = vld [vmem:[%s2691_s5 + $0xc8] sm:$0xff] }
  0xbb   :  { %v379_v61 = vpop.permute.xlu1 %378  ;;  %622 = vmatprep.mubr.f32.mxu0 %v1823_v60  ;;  %1613 = vmatpush1.bf16.msra.mxu1 %v1612_v54  ;;  %v771_v54 = vld [vmem:[%s2691_s5 + $0xd0] sm:$0xff] }
  0xbc   :  { %v439_v63 = vmul.f32 %v2152_v29, %v379_v61 }
  0xbd   :  { %1781 = vset.pattern.permute.xlu1 %v1822_v14  ;;  %v2187_v5 = vpop.permute.xlu0 %131 }
  0xbe   :  { %v455_v6 = vadd.f32 %v439_v63, %v355_v62  ;;  %222 = vperm.xlu1 %1781, %v65_v53   ;;  %623 = vmatmul.mubr.f32.gmra.mrb[2].mxu0 %v493_v3  ;;  %v753_v62 = vld [vmem:[%s2691_s5 + $0x40] sm:$0xff]  ;;  %v755_v63 = vld [vmem:[%s2691_s5 + $0x50] sm:$0xff] }
  0xbf   :  { %628 = vmatprep.mubr.f32.mxu0 %v1823_v60 }
  0xc0   :  { %v92_v11 = vpop.permute.xlu1 %91  ;;  %v478_v12 = vadd.f32 %v2171_v49, %v455_v6  ;;  %v1616_v6 = vpack.c.bf16 %v755_v63, %v753_v62  ;;  %v773_v63 = vld [vmem:[%s2691_s5 + $0xe0] sm:$0xff] }
  0xc1   :  { %v157_v35 = vmul.f32 %v2147_v27, %v92_v11  ;;  %v760_v11 = vld [vmem:[%s2691_s5 + $0x78] sm:$0xff] }
  0xc2   :  { %v283_v13 = vpop.permute.xlu0 %282  ;;  %1783 = vset.pattern.permute.xlu1 %v1820_v1  ;;  %v494_v15 = vmax.f32 %v478_v12, 0.0 }
  0xc3   :  { %v340_v21 = vmul.f32 %v2150_v28, %v283_v13  ;;  %322 = vperm.xlu1 %1783, %v65_v53   ;;  %v1618_v13 = vpack.c.bf16 %v760_v11, %v758_v10 }
  0xc4   :  { %629 = vmatmul.mubr.f32.gmra.mrb[4].mxu0 %v494_v15  ;;  %v759_v15 = vld [vmem:[%s2691_s5 + $0x70] sm:$0xff] }
  0xc5   :  { %v356_v22 = vadd.f32 %v340_v21, %v256_v17  ;;  %v187_v23 = vpop.permute.xlu1 %186  ;;  %634 = vmatprep.mubr.f32.mxu0 %v1823_v60 }
  0xc6   :  { %v295_v9 = vpop.permute.xlu0 %294  ;;  %v241_v33 = vmul.f32 %v2141_v25, %v187_v23 }
  0xc7   :  { %v456_v24 = vadd.f32 %v440_v16, %v356_v22  ;;  %1784 = vset.pattern.permute.xlu1 %v1821_v7  ;;  %v343_v16 = vmul.f32 %v2150_v28, %v295_v9 }
  0xc8   :  { %141 = vperm.xlu1 %1784, %v2091_v2  }
  0xc9   :  { %v479_v30 = vadd.f32 %v2171_v49, %v456_v24  ;;  %v762_v24 = vld [vmem:[%s2691_s5 + $0x88] sm:$0xff] }
  0xca   :  { %v287_v31 = vpop.permute.xlu1 %286  ;;  %v2220_v41 = vpop.permute.xlu0 %306 }
  0xcb   :  { %v495_v32 = vmax.f32 %v479_v30, 0.0  ;;  %v341_v7 = vmul.f32 %v2150_v28, %v287_v31  ;;  %v764_v30 = vld [vmem:[%s2691_s5 + $0x98] sm:$0xff] }
  0xcc   :  { %1785 = vset.pattern.permute.xlu1 %v1819_v0  ;;  %v1622_v9 = vpack.c.bf16 %v764_v30, %v762_v24  ;;  %v788_v24 = vld [vmem:[%s2691_s5 + $0x158] sm:$0xff] }
  0xcd   :  { %422 = vperm.xlu1 %1785, %v65_v53   ;;  %635 = vmatmul.mubr.f32.gmra.mrb[6].mxu0 %v495_v32 }
  0xce   :  { %640 = vmatprep.mubr.f32.mxu0 %v1823_v60  ;;  %v2238_v57 = vpop.permute.xlu0 %318 }
  0xcf   :  { %v97_v34 = vpop.permute.xlu1 %96 }
  0xd0   :  { %v158_v12 = vmul.f32 %v2147_v27, %v97_v34 }
  0xd1   :  { %1786 = vset.pattern.permute.xlu1 %v1820_v1  ;;  %v257_v1 = vadd.f32 %v241_v33, %v157_v35  ;;  %v761_v33 = vld [vmem:[%s2691_s5 + $0x80] sm:$0xff] }
  0xd2   :  { %326 = vperm.xlu1 %1786, %v2091_v2  }
  0xd3   :  { %v357_v44 = vadd.f32 %v341_v7, %v257_v1  ;;  %v395_v21 = vpop.permute.xlu0 %394 }
  0xd4   :  { %v387_v43 = vpop.permute.xlu1 %386  ;;  %v443_v32 = vmul.f32 %v2152_v29, %v395_v21 }
  0xd5   :  { %v441_v45 = vmul.f32 %v2152_v29, %v387_v43  ;;  %v765_v43 = vld [vmem:[%s2691_s5 + $0xa0] sm:$0xff] }
  0xd6   :  { %1788 = vset.pattern.permute.xlu1 %v1822_v14  ;;  %v754_v14 = vld [vmem:[%s2691_s5 + $0x48] sm:$0xff] }
  0xd7   :  { %v457_v53 = vadd.f32 %v441_v45, %v357_v44  ;;  %230 = vperm.xlu1 %1788, %v2102_v4   ;;  %v1614_v61 = vpack.c.bf16 %v756_v59, %v754_v14  ;;  %v767_v44 = vld [vmem:[%s2691_s5 + $0xb0] sm:$0xff] }
  0xd8   :  { %v1628_v45 = vpack.c.bf16 %v767_v44, %v765_v43  ;;  %v796_v43 = vld [vmem:[%s2691_s5 + $0x198] sm:$0xff] }
  0xd9   :  { %v291_v55 = vpop.permute.xlu1 %290  ;;  %v480_v56 = vadd.f32 %v2171_v49, %v457_v53  ;;  %1615 = vmatprep.subr.bf16.mxu1 %v1614_v61  ;;  %v1630_v53 = vpack.c.bf16 %v772_v51, %v770_v50  ;;  %v1632_v61 = vpack.c.bf16 %v771_v54, %v769_v52  ;;  %v793_v51 = vld [vmem:[%s2691_s5 + $0x180] sm:$0xff]  ;;  %v795_v52 = vld [vmem:[%s2691_s5 + $0x190] sm:$0xff]  ;;  %v798_v54 = vld [vmem:[%s2691_s5 + $0x1a8] sm:$0xff] }
  0xda   :  { %1617 = vmatpush1.bf16.msra.mxu1 %v1616_v6  ;;  %v342_v22 = vmul.f32 %v2150_v28, %v291_v55  ;;  %v774_v55 = vld [vmem:[%s2691_s5 + $0xe8] sm:$0xff] }
  0xdb   :  { %1789 = vset.pattern.permute.xlu1 %v1819_v0  ;;  %v496_v3 = vmax.f32 %v480_v56, 0.0  ;;  %v242_v0 = vmul.f32 %v2141_v25, %v2133_v19  ;;  %v1620_v19 = vpack.c.bf16 %v759_v15, %v757_v48  ;;  %1619 = vmatprep.subr.bf16.mxu1 %v1618_v13  ;;  %v776_v56 = vld [vmem:[%s2691_s5 + $0xf8] sm:$0xff]  ;;  %v778_v6 = vld [vmem:[%s2691_s5 + $0x108] sm:$0xff]  ;;  %v779_v13 = vld [vmem:[%s2691_s5 + $0x110] sm:$0xff] }
  0xdc   :  { %426 = vperm.xlu1 %1789, %v2091_v2   ;;  %v1634_v62 = vpack.c.bf16 %v776_v56, %v774_v55  ;;  %v782_v48 = vld [vmem:[%s2691_s5 + $0x128] sm:$0xff]  ;;  %v784_v15 = vld [vmem:[%s2691_s5 + $0x138] sm:$0xff] }
  0xdd   :  { %641 = vmatmul.mubr.f32.gmra.mrb[8].mxu0 %v496_v3  ;;  %v258_v31 = vadd.f32 %v242_v0, %v158_v12  ;;  %v775_v3 = vld [vmem:[%s2691_s5 + $0xf0] sm:$0xff]  ;;  %v1642_v21 = vpack.c.bf16 %v784_v15, %v782_v48  ;;  %v800_v55 = vld [vmem:[%s2691_s5 + $0x1b8] sm:$0xff]  ;;  %v346_v48 = vmul.f32 %v2150_v28, %v2220_v41 }
  0xde   :  { %v195_v2 = vpop.permute.xlu1 %194  ;;  %646 = vmatprep.mubr.f32.mxu0 %v1823_v60  ;;  %1621 = vmatpush1.bf16.msra.mxu1 %v1620_v19  ;;  %v1636_v11 = vpack.c.bf16 %v775_v3, %v773_v63  ;;  %v781_v19 = vld [vmem:[%s2691_s5 + $0x120] sm:$0xff]  ;;  %v799_v63 = vld [vmem:[%s2691_s5 + $0x1b0] sm:$0xff] }
  0xdf   :  { %v243_v17 = vmul.f32 %v2141_v25, %v195_v2  ;;  %v358_v36 = vadd.f32 %v342_v22, %v258_v31  ;;  %1623 = vmatprep.subr.bf16.mxu1 %v1622_v9  ;;  %v777_v2 = vld [vmem:[%s2691_s5 + $0x100] sm:$0xff]  ;;  %v783_v22 = vld [vmem:[%s2691_s5 + $0x130] sm:$0xff] }
  0xe0   :  { %430 = vperm.xlu1 %1789, %v2102_v4   ;;  %v763_v4 = vld [vmem:[%s2691_s5 + $0x90] sm:$0xff]  ;;  %v1644_v30 = vpack.c.bf16 %v783_v22, %v781_v19  ;;  %v801_v19 = vld [vmem:[%s2691_s5 + $0x1c0] sm:$0xff] }
  0xe1   :  { %v259_v23 = vadd.f32 %v243_v17, %v159_v8  ;;  %v1624_v7 = vpack.c.bf16 %v763_v4, %v761_v33  ;;  %v780_v8 = vld [vmem:[%s2691_s5 + $0x118] sm:$0xff]  ;;  %v787_v9 = vld [vmem:[%s2691_s5 + $0x150] sm:$0xff] }
  0xe2   :  { %v1638_v12 = vpack.c.bf16 %v780_v8, %v778_v6  ;;  %v802_v6 = vld [vmem:[%s2691_s5 + $0x1c8] sm:$0xff]  ;;  %v804_v8 = vld [vmem:[%s2691_s5 + $0x1d8] sm:$0xff]  ;;  %v803_v22 = vld [vmem:[%s2691_s5 + $0x1d0] sm:$0xff] }
  0xe3   :  { %v359_v34 = vadd.f32 %v343_v16, %v259_v23  ;;  %v391_v35 = vpop.permute.xlu1 %390  ;;  %1625 = vmatpush1.bf16.msra.mxu1 %v1624_v7  ;;  %v1640_v16 = vpack.c.bf16 %v779_v13, %v777_v2  ;;  %v786_v23 = vld [vmem:[%s2691_s5 + $0x148] sm:$0xff]  ;;  %v1662_v13 = vpack.c.bf16 %v804_v8, %v802_v6  ;;  %v165_v6 = vmul.f32 %v2147_v27, %v2187_v5 }
  0xe4   :  { %v442_v37 = vmul.f32 %v2152_v29, %v391_v35  ;;  %1627 = vmatprep.subr.bf16.mxu1 %v1626_v42  ;;  %v1646_v31 = vpack.c.bf16 %v788_v24, %v786_v23  ;;  %v792_v35 = vld [vmem:[%s2691_s5 + $0x178] sm:$0xff]  ;;  %v794_v42 = vld [vmem:[%s2691_s5 + $0x188] sm:$0xff]  ;;  %v1664_v24 = vpack.c.bf16 %v803_v22, %v801_v19 }
  0xe5   :  { %v459_v40 = vadd.f32 %v443_v32, %v359_v34  ;;  %v785_v32 = vld [vmem:[%s2691_s5 + $0x140] sm:$0xff]  ;;  %v790_v34 = vld [vmem:[%s2691_s5 + $0x168] sm:$0xff]  ;;  %v1654_v50 = vpack.c.bf16 %v796_v43, %v794_v42 }
  0xe6   :  { %v458_v1 = vadd.f32 %v442_v37, %v358_v36  ;;  %v1648_v37 = vpack.c.bf16 %v787_v9, %v785_v32  ;;  %v1650_v38 = vpack.c.bf16 %v792_v35, %v790_v34  ;;  %v806_v32 = vld [vmem:[%s2691_s5 + $0x1e8] sm:$0xff]  ;;  %v808_v9 = vld [vmem:[%s2691_s5 + $0x1f8] sm:$0xff]  ;;  %v805_v35 = vld [vmem:[%s2691_s5 + $0x1e0] sm:$0xff] }
  0xe7   :  { %1629 = vmatpush1.bf16.msra.mxu1 %v1628_v45  ;;  %v482_v59 = vadd.f32 %v2171_v49, %v459_v40  ;;  %v791_v40 = vld [vmem:[%s2691_s5 + $0x170] sm:$0xff]  ;;  %v1666_v34 = vpack.c.bf16 %v808_v9, %v806_v32 }
  0xe8   :  { %v107_v46 = vpop.permute.xlu1 %106  ;;  %v481_v47 = vadd.f32 %v2171_v49, %v458_v1  ;;  %1631 = vmatprep.subr.bf16.mxu1 %v1630_v53 }
  0xe9   :  { %v498_v0 = vmax.f32 %v482_v59, 0.0  ;;  %v160_v7 = vmul.f32 %v2147_v27, %v107_v46  ;;  %v1656_v59 = vpack.c.bf16 %v795_v52, %v793_v51 }
  0xea   :  { %v497_v14 = vmax.f32 %v481_v47, 0.0  ;;  %v1652_v47 = vpack.c.bf16 %v791_v40, %v789_v39 }
  0xeb   :  { %1633 = vmatpush1.bf16.msra.mxu1 %v1632_v61  ;;  %v1658_v61 = vpack.c.bf16 %v800_v55, %v798_v54 }
  0xec   :  { %647 = vmatmul.mubr.f32.gmra.mrb[10].mxu0 %v497_v14  ;;  %1635 = vmatprep.subr.bf16.mxu1 %v1634_v62  ;;  %v797_v62 = vld [vmem:[%s2691_s5 + $0x1a0] sm:$0xff] }
  0xed   :  { %v199_v10 = vpop.permute.xlu1 %198  ;;  %652 = vmatprep.mubr.f32.mxu0 %v1823_v60 }
  0xee   :  { %v244_v33 = vmul.f32 %v2141_v25, %v199_v10  ;;  %v162_v10 = vmul.f32 %v2147_v27, %v2182_v58 }
  0xef   :  { %1637 = vmatpush1.bf16.msra.mxu1 %v1636_v11  ;;  %v1660_v11 = vpack.c.bf16 %v799_v63, %v797_v62 }
  0xf0   :  { %653 = vmatmul.mubr.f32.gmra.mrb[12].mxu0 %v498_v0  ;;  %1639 = vmatprep.subr.bf16.mxu1 %v1638_v12  ;;  %v260_v1 = vadd.f32 %v244_v33, %v160_v7  ;;  %v245_v0 = vmul.f32 %v2141_v25, %v2143_v26  ;;  %v807_v7 = vld [vmem:[%s2691_s5 + $0x1f0] sm:$0xff] }
  0xf1   :  { %658 = vmatprep.mubr.f32.mxu0 %v1823_v60 }
  0xf2   :  { %v299_v17 = vpop.permute.xlu1 %298 }
  0xf3   :  { %1641 = vmatpush1.bf16.msra.mxu1 %v1640_v16  ;;  %v344_v36 = vmul.f32 %v2150_v28, %v299_v17  ;;  %v407_v16 = vpop.permute.xlu0 %406 }
  0xf4   :  { %1643 = vmatprep.subr.bf16.mxu1 %v1642_v21  ;;  %v446_v26 = vmul.f32 %v2152_v29, %v407_v16 }
  0xf5   :  { %v360_v45 = vadd.f32 %v344_v36, %v260_v1  ;;  %v1668_v36 = vpack.c.bf16 %v807_v7, %v805_v35 }
  0xf7   :  { %v112_v4 = vpop.permute.xlu1 %111  ;;  %1645 = vmatpush1.bf16.msra.mxu1 %v1644_v30 }
  0xf8   :  { %1647 = vmatprep.subr.bf16.mxu1 %v1646_v31  ;;  %v161_v12 = vmul.f32 %v2147_v27, %v112_v4 }
  0xfa   :  { %v261_v21 = vadd.f32 %v245_v0, %v161_v12 }
  0xfb   :  { %1649 = vmatpush1.bf16.msra.mxu1 %v1648_v37 }
  0xfc   :  { %v399_v44 = vpop.permute.xlu1 %398  ;;  %1651 = vmatprep.subr.bf16.mxu1 %v1650_v38 }
  0xfd   :  { %v444_v46 = vmul.f32 %v2152_v29, %v399_v44 }
  0xff   :  { %v460_v53 = vadd.f32 %v444_v46, %v360_v45  ;;  %1653 = vmatpush1.bf16.msra.mxu1 %v1652_v47 }
 0x100   :  { %1655 = vmatprep.subr.bf16.mxu1 %v1654_v50 }
 0x101   :  { %v303_v56 = vpop.permute.xlu1 %302  ;;  %v483_v14 = vadd.f32 %v2171_v49, %v460_v53  ;;  %v419_v53 = vpop.permute.xlu0 %418 }
 0x102   :  { %v345_v58 = vmul.f32 %v2150_v28, %v303_v56  ;;  %v449_v12 = vmul.f32 %v2152_v29, %v419_v53 }
 0x103   :  { %v499_v3 = vmax.f32 %v483_v14, 0.0  ;;  %1657 = vmatpush1.bf16.msra.mxu1 %v1656_v59 }
 0x104   :  { %1659 = vmatprep.subr.bf16.mxu1 %v1658_v61  ;;  %v361_v30 = vadd.f32 %v345_v58, %v261_v21 }
 0x105   :  { %659 = vmatmul.mubr.f32.gmra.mrb[14].mxu0 %v499_v3  ;;  %v215_v59 = vpop.permute.xlu0 %214 }
 0x106   :  { %v207_v2 = vpop.permute.xlu1 %206  ;;  %664 = vmatprep.mubr.f32.mxu0 %v1823_v60  ;;  %v248_v62 = vmul.f32 %v2141_v25, %v215_v59 }
 0x107   :  { %v246_v15 = vmul.f32 %v2141_v25, %v207_v2  ;;  %1661 = vmatpush1.bf16.msra.mxu1 %v1660_v11  ;;  %v349_v11 = vmul.f32 %v2150_v28, %v2238_v57 }
 0x108   :  { %1663 = vmatprep.subr.bf16.mxu1 %v1662_v13 }
 0x109   :  { %v262_v17 = vadd.f32 %v246_v15, %v162_v10 }
 0x10b   :  { %v362_v41 = vadd.f32 %v346_v48, %v262_v17  ;;  %v403_v23 = vpop.permute.xlu1 %402  ;;  %1665 = vmatpush1.bf16.msra.mxu1 %v1664_v24 }
 0x10c   :  { %v445_v31 = vmul.f32 %v2152_v29, %v403_v23  ;;  %1667 = vmatprep.subr.bf16.mxu1 %v1666_v34  ;;  %v227_v34 = vpop.permute.xlu0 %226 }
 0x10d   :  { %v462_v33 = vadd.f32 %v446_v26, %v362_v41 }
 0x10e   :  { %v461_v4 = vadd.f32 %v445_v31, %v361_v30 }
 0x10f   :  { %1669 = vmatpush1.bf16.msra.mxu1 %v1668_v36  ;;  %v485_v40 = vadd.f32 %v2171_v49, %v462_v33 }
 0x110   :  { %v122_v37 = vpop.permute.xlu1 %121  ;;  %v484_v38 = vadd.f32 %v2171_v49, %v461_v4 }
 0x111   :  { %v501_v42 = vmax.f32 %v485_v40, 0.0  ;;  %v163_v46 = vmul.f32 %v2147_v27, %v122_v37  ;;  %v147_v37 = vpop.permute.xlu0 %146 }
 0x112   :  { %v500_v39 = vmax.f32 %v484_v38, 0.0 }
 0x114   :  { %665 = vmatmul.mubr.f32.gmra.mrb[16].mxu0 %v500_v39  ;;  %v251_v39 = vmul.f32 %v2141_v25, %v227_v34 }
 0x115   :  { %v211_v1 = vpop.permute.xlu1 %210  ;;  %670 = vmatprep.mubr.f32.mxu0 %v1823_v60 }
 0x116   :  { %v247_v44 = vmul.f32 %v2141_v25, %v211_v1 }
 0x118   :  { %671 = vmatmul.mubr.f32.gmra.mrb[18].mxu0 %v501_v42  ;;  %v263_v50 = vadd.f32 %v247_v44, %v163_v46 }
 0x119   :  { %676 = vmatprep.mubr.f32.mxu0 %v1823_v60 }
 0x11a   :  { %v311_v43 = vpop.permute.xlu1 %310 }
 0x11b   :  { %v347_v47 = vmul.f32 %v2150_v28, %v311_v43  ;;  %v168_v43 = vmul.f32 %v2147_v27, %v147_v37  ;;  %v1031_v37 = vld [vmem:[#allocation2 + $0x88] sm:$0xff] }
 0x11d   :  { %v363_v52 = vadd.f32 %v347_v47, %v263_v50 }
 0x11f   :  { %v127_v45 = vpop.permute.xlu1 %126 }
 0x120   :  { %v164_v63 = vmul.f32 %v2147_v27, %v127_v45  ;;  %v331_v45 = vpop.permute.xlu0 %330 }
 0x122   :  { %v264_v2 = vadd.f32 %v248_v62, %v164_v63 }
 0x124   :  { %v411_v51 = vpop.permute.xlu1 %410 }
 0x125   :  { %v447_v54 = vmul.f32 %v2152_v29, %v411_v51 }
 0x127   :  { %v463_v55 = vadd.f32 %v447_v54, %v363_v52  ;;  %v352_v52 = vmul.f32 %v2150_v28, %v331_v45 }
 0x129   :  { %v315_v56 = vpop.permute.xlu1 %314  ;;  %v486_v14 = vadd.f32 %v2171_v49, %v463_v55 }
 0x12a   :  { %v348_v10 = vmul.f32 %v2150_v28, %v315_v56 }
 0x12b   :  { %v502_v61 = vmax.f32 %v486_v14, 0.0 }
 0x12c   :  { %v364_v15 = vadd.f32 %v348_v10, %v264_v2 }
 0x12d   :  { %677 = vmatmul.mubr.f32.gmra.mrb[20].mxu0 %v502_v61 }
 0x12e   :  { %v219_v3 = vpop.permute.xlu1 %218  ;;  %682 = vmatprep.mubr.f32.mxu0 %v1823_v60 }
 0x12f   :  { %v249_v8 = vmul.f32 %v2141_v25, %v219_v3 }
 0x131   :  { %v265_v0 = vadd.f32 %v249_v8, %v165_v6 }
 0x133   :  { %v365_v13 = vadd.f32 %v349_v11, %v265_v0  ;;  %v415_v48 = vpop.permute.xlu1 %414 }
 0x134   :  { %v448_v16 = vmul.f32 %v2152_v29, %v415_v48 }
 0x135   :  { %v465_v17 = vadd.f32 %v449_v12, %v365_v13 }
 0x136   :  { %v464_v58 = vadd.f32 %v448_v16, %v364_v15 }
 0x137   :  { %v488_v19 = vadd.f32 %v2171_v49, %v465_v17 }
 0x138   :  { %v137_v21 = vpop.permute.xlu1 %136  ;;  %v487_v5 = vadd.f32 %v2171_v49, %v464_v58 }
 0x139   :  { %v504_v57 = vmax.f32 %v488_v19, 0.0  ;;  %v166_v30 = vmul.f32 %v2147_v27, %v137_v21 }
 0x13a   :  { %v503_v26 = vmax.f32 %v487_v5, 0.0 }
 0x13c   :  { %683 = vmatmul.mubr.f32.gmra.mrb[22].mxu0 %v503_v26 }
 0x13d   :  { %v223_v22 = vpop.permute.xlu1 %222  ;;  %688 = vmatprep.mubr.f32.mxu0 %v1823_v60 }
 0x13e   :  { %v250_v23 = vmul.f32 %v2141_v25, %v223_v22 }
 0x140   :  { %689 = vmatmul.mubr.f32.gmra.mrb[24].mxu0 %v504_v57  ;;  %v266_v32 = vadd.f32 %v250_v23, %v166_v30 }
 0x141   :  { %694 = vmatprep.mubr.f32.mxu0 %v1823_v60 }
 0x142   :  { %v323_v41 = vpop.permute.xlu1 %322 }
 0x143   :  { %v350_v31 = vmul.f32 %v2150_v28, %v323_v41 }
 0x145   :  { %v366_v33 = vadd.f32 %v350_v31, %v266_v32 }
 0x147   :  { %v142_v24 = vpop.permute.xlu1 %141 }
 0x148   :  { %v167_v40 = vmul.f32 %v2147_v27, %v142_v24 }
 0x14a   :  { %v267_v46 = vadd.f32 %v251_v39, %v167_v40 }
 0x14c   :  { %v423_v9 = vpop.permute.xlu1 %422 }
 0x14d   :  { %v450_v4 = vmul.f32 %v2152_v29, %v423_v9 }
 0x14f   :  { %v466_v35 = vadd.f32 %v450_v4, %v366_v33 }
 0x151   :  { %v327_v7 = vpop.permute.xlu1 %326  ;;  %v489_v36 = vadd.f32 %v2171_v49, %v466_v35 }
 0x152   :  { %v351_v42 = vmul.f32 %v2150_v28, %v327_v7  ;;  %v540_v28 = vld [vmem:[%s2690_s4] sm:$0x3] }
 0x153   :  { %v505_v38 = vmax.f32 %v489_v36, 0.0  ;;  %v2488_v63 = vrot.slane %v540_v28, %v2135_v20  ;;  %v1030_v36 = vld [vmem:[#allocation2 + $0x80] sm:$0xff] }
 0x154   :  { %v367_v50 = vadd.f32 %v351_v42, %v267_v46  ;;  %v1015_v42 = vld [vmem:[#allocation2 + $0x8] sm:$0xff] }
 0x155   :  { %695 = vmatmul.mubr.f32.gmra.mrb[26].mxu0 %v505_v38  ;;  %v1014_v38 = vld [vmem:[#allocation2] sm:$0xff] }
 0x156   :  { %v231_v1 = vpop.permute.xlu1 %230  ;;  %700 = vmatprep.mubr.f32.mxu0 %v1823_v60 }
 0x157   :  { %v252_v44 = vmul.f32 %v2141_v25, %v231_v1  ;;  %v1670_v1 = vpack.c.bf16 %v1031_v37, %v1030_v36 }
 0x159   :  { %v268_v51 = vadd.f32 %v252_v44, %v168_v43  ;;  %v1032_v43 = vld [vmem:[#allocation2 + $0x90] sm:$0xff]  ;;  %v1033_v44 = vld [vmem:[#allocation2 + $0x98] sm:$0xff]  ;;  %1671 = vmatprep.subr.bf16.mxu0 %v1670_v1 }
 0x15b   :  { %v427_v47 = vpop.permute.xlu1 %426  ;;  %v368_v56 = vadd.f32 %v352_v52, %v268_v51  ;;  %v1674_v51 = vpack.c.bf16 %v1033_v44, %v1032_v43  ;;  %v1016_v52 = vld [vmem:[#allocation2 + $0x10] sm:$0xff] }
 0x15c   :  { %v451_v53 = vmul.f32 %v2152_v29, %v427_v47 }
 0x15e   :  { %v467_v54 = vadd.f32 %v451_v53, %v367_v50  ;;  %v1672_v50 = vpack.c.bf16 %v1015_v42, %v1014_v38  ;;  %v1017_v53 = vld [vmem:[#allocation2 + $0x18] sm:$0xff]  ;;  %v1028_v38 = vld [vmem:[#allocation2 + $0x70] sm:$0xff] }
 0x15f   :  { %v431_v55 = vpop.permute.xlu1 %430 }
 0x160   :  { %v452_v14 = vmul.f32 %v2152_v29, %v431_v55  ;;  %v490_v59 = vadd.f32 %v2171_v49, %v467_v54  ;;  %v2491_v29 = vrot.slane %v540_v28, %v2130_v18  ;;  %v1034_v54 = vld [vmem:[#allocation2 + $0xa0] sm:$0xff]  ;;  %1673 = vmatpush3.bf16.msra.mxu0 %v1672_v50  ;;  %v1036_v28 = vld [vmem:[#allocation2 + $0xb0] sm:$0xff] }
 0x161   :  { %1675 = vmatprep.subr.bf16.mxu0 %v1674_v51 }
 0x162   :  { %v468_v61 = vadd.f32 %v452_v14, %v368_v56  ;;  %v506_v27 = vmax.f32 %v490_v59, 0.0  ;;  %v1035_v56 = vld [vmem:[#allocation2 + $0xa8] sm:$0xff]  ;;  %v1676_v14 = vpack.c.bf16 %v1017_v53, %v1016_v52 }
 0x164   :  { %701 = vmatmul.mubr.f32.gmra.mrb[28].mxu0 %v506_v27  ;;  %v491_v25 = vadd.f32 %v2171_v49, %v468_v61  ;;  %v1678_v61 = vpack.c.bf16 %v1035_v56, %v1034_v54  ;;  %v1018_v27 = vld [vmem:[#allocation2 + $0x20] sm:$0xff] }
 0x165   :  { %706 = vmatprep.mubr.f32.mxu0 %v1823_v60  ;;  %1677 = vmatpush3.bf16.msra.mxu0 %v1676_v14 }
 0x166   :  { %v507_v62 = vmax.f32 %v491_v25, 0.0  ;;  %v1019_v25 = vld [vmem:[#allocation2 + $0x28] sm:$0xff]  ;;  %1679 = vmatprep.subr.bf16.mxu0 %v1678_v61 }
 0x168   :  { %707 = vmatmul.mubr.f32.gmra.mrb[30].mxu0 %v507_v62 }
 0x18d   :  { %v618_v3 = vpop.f32.mrb[0].mxu0 }
 0x18e   :  { %v619_v6 = vadd.f32 %v618_v3, %v2488_v63  ;;  %v620_v8 = vpop.f32.mrb[1].mxu0  ;;  %v1037_v3 = vld [vmem:[#allocation2 + $0xb8] sm:$0xff] }
 0x18f   :  { %v621_v49 = vadd.f32 %v620_v8, %v2491_v29  ;;  %v1682_v8 = vpack.c.bf16 %v1037_v3, %v1036_v28 }
 0x190   :  { %v713_v11 = vmax.f32 %v619_v6, 0.0  ;;  %v1680_v6 = vpack.c.bf16 %v1019_v25, %v1018_v27 }
 0x191   :  { %v624_v10 = vpop.f32.mrb[2].mxu0  ;;  %v714_v60 = vmax.f32 %v621_v49, 0.0  ;;  %v1020_v49 = vld [vmem:[#allocation2 + $0x30] sm:$0xff] }
 0x192   :  { %v625_v0 = vadd.f32 %v624_v10, %v2488_v63  ;;  %v626_v12 = vpop.f32.mrb[3].mxu0  ;;  %v1021_v10 = vld [vmem:[#allocation2 + $0x38] sm:$0xff]  ;;  %1681 = vmatpush3.bf16.msra.mxu0 %v1680_v6 }
 0x193   :  { %v627_v2 = vadd.f32 %v626_v12, %v2491_v29  ;;  %885 = vmatprep.mubr.f32.mxu1 %v714_v60  ;;  %v1038_v60 = vld [vmem:[#allocation2 + $0xc0] sm:$0xff]  ;;  %1683 = vmatprep.subr.bf16.mxu0 %v1682_v8 }
 0x194   :  { %886 = vmatmul.mubr.f32.vlgmr.msra.gmra.mrb[0].mxu1 %v713_v11  ;;  %v715_v48 = vmax.f32 %v625_v0, 0.0  ;;  %v1039_v11 = vld [vmem:[#allocation2 + $0xc8] sm:$0xff]  ;;  %v1684_v0 = vpack.c.bf16 %v1021_v10, %v1020_v49 }
 0x195   :  { %v716_v13 = vmax.f32 %v627_v2, 0.0  ;;  %v1686_v12 = vpack.c.bf16 %v1039_v11, %v1038_v60  ;;  %v1022_v2 = vld [vmem:[#allocation2 + $0x40] sm:$0xff] }
 0x196   :  { %1685 = vmatpush3.bf16.msra.mxu0 %v1684_v0 }
 0x197   :  { %v630_v15 = vpop.f32.mrb[4].mxu0  ;;  %891 = vmatprep.mubr.f32.mxu1 %v716_v13  ;;  %v1023_v13 = vld [vmem:[#allocation2 + $0x48] sm:$0xff]  ;;  %1687 = vmatprep.subr.bf16.mxu0 %v1686_v12 }
 0x198   :  { %v631_v16 = vadd.f32 %v630_v15, %v2488_v63  ;;  %v632_v58 = vpop.f32.mrb[5].mxu0  ;;  %892 = vmatmul.mubr.f32.gmra.mrb[2].mxu1 %v715_v48  ;;  %v1040_v48 = vld [vmem:[#allocation2 + $0xd0] sm:$0xff]  ;;  %v1041_v15 = vld [vmem:[#allocation2 + $0xd8] sm:$0xff] }
 0x199   :  { %v633_v17 = vadd.f32 %v632_v58, %v2491_v29  ;;  %v1690_v58 = vpack.c.bf16 %v1041_v15, %v1040_v48 }
 0x19a   :  { %v717_v5 = vmax.f32 %v631_v16, 0.0  ;;  %v1688_v16 = vpack.c.bf16 %v1023_v13, %v1022_v2 }
 0x19b   :  { %v718_v21 = vmax.f32 %v633_v17, 0.0  ;;  %v1024_v17 = vld [vmem:[#allocation2 + $0x50] sm:$0xff] }
 0x19c   :  { %1689 = vmatpush3.bf16.msra.mxu0 %v1688_v16 }
 0x19d   :  { %897 = vmatprep.mubr.f32.mxu1 %v718_v21  ;;  %v1025_v21 = vld [vmem:[#allocation2 + $0x58] sm:$0xff]  ;;  %1691 = vmatprep.subr.bf16.mxu0 %v1690_v58 }
 0x19e   :  { %898 = vmatmul.mubr.f32.gmra.mrb[4].mxu1 %v717_v5  ;;  %v1042_v5 = vld [vmem:[#allocation2 + $0xe0] sm:$0xff] }
 0x1a0   :  { %v636_v26 = vpop.f32.mrb[6].mxu0 }
 0x1a1   :  { %v637_v19 = vadd.f32 %v636_v26, %v2488_v63  ;;  %v638_v22 = vpop.f32.mrb[7].mxu0  ;;  %v1043_v26 = vld [vmem:[#allocation2 + $0xe8] sm:$0xff] }
 0x1a2   :  { %v639_v57 = vadd.f32 %v638_v22, %v2491_v29  ;;  %v1694_v22 = vpack.c.bf16 %v1043_v26, %v1042_v5 }
 0x1a3   :  { %v719_v23 = vmax.f32 %v637_v19, 0.0  ;;  %v1692_v19 = vpack.c.bf16 %v1025_v21, %v1024_v17 }
 0x1a4   :  { %v720_v41 = vmax.f32 %v639_v57, 0.0 }
 0x1a5   :  { %1693 = vmatpush3.bf16.msra.mxu0 %v1692_v19 }
 0x1a6   :  { %903 = vmatprep.mubr.f32.mxu1 %v720_v41  ;;  %1695 = vmatprep.subr.bf16.mxu0 %v1694_v22 }
 0x1a7   :  { %904 = vmatmul.mubr.f32.gmra.mrb[6].mxu1 %v719_v23 }
 0x1b0   :  { %v642_v24 = vpop.f32.mrb[8].mxu0 }
 0x1b1   :  { %v643_v30 = vadd.f32 %v642_v24, %v2488_v63  ;;  %v644_v31 = vpop.f32.mrb[9].mxu0 }
 0x1b2   :  { %v645_v32 = vadd.f32 %v644_v31, %v2491_v29 }
 0x1b3   :  { %v721_v33 = vmax.f32 %v643_v30, 0.0 }
 0x1b4   :  { %v722_v9 = vmax.f32 %v645_v32, 0.0  ;;  %v1026_v32 = vld [vmem:[#allocation2 + $0x60] sm:$0xff] }
 0x1b6   :  { %909 = vmatprep.mubr.f32.mxu1 %v722_v9  ;;  %v1027_v9 = vld [vmem:[#allocation2 + $0x68] sm:$0xff] }
 0x1b7   :  { %910 = vmatmul.mubr.f32.gmra.mrb[8].mxu1 %v721_v33  ;;  %v1696_v33 = vpack.c.bf16 %v1027_v9, %v1026_v32 }
 0x1b9   :  { %1697 = vmatpush3.bf16.msra.mxu0 %v1696_v33 }
 0x1bf   :  { %v648_v4 = vpop.f32.mrb[10].mxu0 }
 0x1c0   :  { %v649_v34 = vadd.f32 %v648_v4, %v2488_v63  ;;  %v650_v35 = vpop.f32.mrb[11].mxu0 }
 0x1c1   :  { %v651_v7 = vadd.f32 %v650_v35, %v2491_v29  ;;  %v1045_v35 = vld [vmem:[#allocation2 + $0xf8] sm:$0xff] }
 0x1c2   :  { %v723_v45 = vmax.f32 %v649_v34, 0.0  ;;  %v1044_v34 = vld [vmem:[#allocation2 + $0xf0] sm:$0xff] }
 0x1c3   :  { %v724_v39 = vmax.f32 %v651_v7, 0.0  ;;  %v654_v40 = vpop.f32.mrb[12].mxu0  ;;  %v1698_v37 = vpack.c.bf16 %v1045_v35, %v1044_v34 }
 0x1c4   :  { %v655_v46 = vadd.f32 %v654_v40, %v2488_v63  ;;  %v656_v47 = vpop.f32.mrb[13].mxu0 }
 0x1c5   :  { %v657_v55 = vadd.f32 %v656_v47, %v2491_v29  ;;  %915 = vmatprep.mubr.f32.mxu1 %v724_v39  ;;  %v1029_v39 = vld [vmem:[#allocation2 + $0x78] sm:$0xff]  ;;  %1699 = vmatprep.subr.bf16.mxu0 %v1698_v37 }
 0x1c6   :  { %916 = vmatmul.mubr.f32.gmra.mrb[10].mxu1 %v723_v45  ;;  %v725_v62 = vmax.f32 %v655_v46, 0.0  ;;  %v1700_v1 = vpack.c.bf16 %v1029_v39, %v1028_v38 }
 0x1c7   :  { %v726_v59 = vmax.f32 %v657_v55, 0.0 }
 0x1c8   :  { %1701 = vmatpush3.bf16.msra.mxu0 %v1700_v1 }
 0x1c9   :  { %921 = vmatprep.mubr.f32.mxu1 %v726_v59 }
 0x1ca   :  { %922 = vmatmul.mubr.f32.gmra.mrb[12].mxu1 %v725_v62 }
 0x1d8   :  { %v660_v57 = vpop.f32.mrb[14].mxu0 }
 0x1d9   :  { %v661_v41 = vadd.f32 %v660_v57, %v2488_v63  ;;  %v662_v23 = vpop.f32.mrb[15].mxu0 }
 0x1da   :  { %v663_v24 = vadd.f32 %v662_v23, %v2491_v29 }
 0x1db   :  { %v727_v31 = vmax.f32 %v661_v41, 0.0 }
 0x1dc   :  { %v728_v30 = vmax.f32 %v663_v24, 0.0  ;;  %v809_v24 = vld [vmem:[%s2692_s6] sm:$0x3] }
 0x1de   :  { %927 = vmatprep.mubr.f32.mxu1 %v728_v30  ;;  %v2529_v30 = vrot.slane %v809_v24, %v2135_v20 }
 0x1df   :  { %928 = vmatmul.mubr.f32.gmra.mrb[14].mxu1 %v727_v31  ;;  %v2532_v31 = vrot.slane %v809_v24, %v2130_v18 }
 0x1e7   :  { %v666_v4 = vpop.f32.mrb[16].mxu0 }
 0x1e8   :  { %v667_v7 = vadd.f32 %v666_v4, %v2488_v63  ;;  %v668_v36 = vpop.f32.mrb[17].mxu0 }
 0x1e9   :  { %v669_v40 = vadd.f32 %v668_v36, %v2491_v29 }
 0x1ea   :  { %v729_v44 = vmax.f32 %v667_v7, 0.0 }
 0x1eb   :  { %v730_v42 = vmax.f32 %v669_v40, 0.0  ;;  %v672_v43 = vpop.f32.mrb[18].mxu0 }
 0x1ec   :  { %v673_v45 = vadd.f32 %v672_v43, %v2488_v63  ;;  %v674_v46 = vpop.f32.mrb[19].mxu0 }
 0x1ed   :  { %v675_v47 = vadd.f32 %v674_v46, %v2491_v29  ;;  %933 = vmatprep.mubr.f32.mxu1 %v730_v42 }
 0x1ee   :  { %934 = vmatmul.mubr.f32.gmra.mrb[16].mxu1 %v729_v44  ;;  %v731_v51 = vmax.f32 %v673_v45, 0.0 }
 0x1ef   :  { %v732_v50 = vmax.f32 %v675_v47, 0.0 }
 0x1f1   :  { %939 = vmatprep.mubr.f32.mxu1 %v732_v50 }
 0x1f2   :  { %940 = vmatmul.mubr.f32.gmra.mrb[18].mxu1 %v731_v51 }
 0x200   :  { %v678_v52 = vpop.f32.mrb[20].mxu0 }
 0x201   :  { %v679_v53 = vadd.f32 %v678_v52, %v2488_v63  ;;  %v680_v54 = vpop.f32.mrb[21].mxu0 }
 0x202   :  { %v681_v55 = vadd.f32 %v680_v54, %v2491_v29 }
 0x203   :  { %v733_v14 = vmax.f32 %v679_v53, 0.0 }
 0x204   :  { %v734_v56 = vmax.f32 %v681_v55, 0.0 }
 0x206   :  { %945 = vmatprep.mubr.f32.mxu1 %v734_v56 }
 0x207   :  { %946 = vmatmul.mubr.f32.gmra.mrb[20].mxu1 %v733_v14 }
 0x20f   :  { %v684_v59 = vpop.f32.mrb[22].mxu0 }
 0x210   :  { %v685_v61 = vadd.f32 %v684_v59, %v2488_v63  ;;  %v686_v27 = vpop.f32.mrb[23].mxu0 }
 0x211   :  { %v687_v25 = vadd.f32 %v686_v27, %v2491_v29 }
 0x212   :  { %v735_v3 = vmax.f32 %v685_v61, 0.0 }
 0x213   :  { %v736_v62 = vmax.f32 %v687_v25, 0.0  ;;  %v690_v28 = vpop.f32.mrb[24].mxu0  ;;  %v1214_v25 = vld [vmem:[%s2695_s9] sm:$0xff] }
 0x214   :  { %v691_v6 = vadd.f32 %v690_v28, %v2488_v63  ;;  %v692_v8 = vpop.f32.mrb[25].mxu0  ;;  %v1216_v28 = vld [vmem:[%s2695_s9 + $0x10] sm:$0xff] }
 0x215   :  { %v693_v49 = vadd.f32 %v692_v8, %v2491_v29  ;;  %951 = vmatprep.mubr.f32.mxu1 %v736_v62  ;;  %v1215_v62 = vld [vmem:[%s2695_s9 + $0x8] sm:$0xff] }
 0x216   :  { %952 = vmatmul.mubr.f32.gmra.mrb[22].mxu1 %v735_v3  ;;  %v737_v60 = vmax.f32 %v691_v6, 0.0  ;;  %v1702_v8 = vpack.c.bf16 %v1215_v62, %v1214_v25 }
 0x217   :  { %v738_v10 = vmax.f32 %v693_v49, 0.0  ;;  %v1217_v49 = vld [vmem:[%s2695_s9 + $0x18] sm:$0xff] }
 0x218   :  { %1703 = vmatprep.subr.bf16.mxu1 %v1702_v8 }
 0x219   :  { %957 = vmatprep.mubr.f32.mxu1 %v738_v10  ;;  %1705 = vmatpush3.bf16.msra.mxu1 %v1702_v8 }
 0x21a   :  { %958 = vmatmul.mubr.f32.gmra.mrb[24].mxu1 %v737_v60 }
 0x228   :  { %v696_v11 = vpop.f32.mrb[26].mxu0 }
 0x229   :  { %v697_v0 = vadd.f32 %v696_v11, %v2488_v63  ;;  %v698_v12 = vpop.f32.mrb[27].mxu0 }
 0x22a   :  { %v699_v2 = vadd.f32 %v698_v12, %v2491_v29  ;;  %v1218_v12 = vld [vmem:[%s2695_s9 + $0x20] sm:$0xff] }
 0x22b   :  { %v739_v48 = vmax.f32 %v697_v0, 0.0  ;;  %v1706_v0 = vpack.c.bf16 %v1217_v49, %v1216_v28 }
 0x22c   :  { %v740_v13 = vmax.f32 %v699_v2, 0.0  ;;  %v1219_v2 = vld [vmem:[%s2695_s9 + $0x28] sm:$0xff] }
 0x22d   :  { %1707 = vmatprep.subr.bf16.mxu1 %v1706_v0 }
 0x22e   :  { %963 = vmatprep.mubr.f32.mxu1 %v740_v13  ;;  %1709 = vmatpush3.bf16.msra.mxu1 %v1706_v0 }
 0x22f   :  { %964 = vmatmul.mubr.f32.gmra.mrb[26].mxu1 %v739_v48 }
 0x237   :  { %v702_v15 = vpop.f32.mrb[28].mxu0 }
 0x238   :  { %v703_v16 = vadd.f32 %v702_v15, %v2488_v63  ;;  %v704_v58 = vpop.f32.mrb[29].mxu0  ;;  %v1710_v15 = vpack.c.bf16 %v1219_v2, %v1218_v12 }
 0x239   :  { %v705_v17 = vadd.f32 %v704_v58, %v2491_v29  ;;  %v1220_v58 = vld [vmem:[%s2695_s9 + $0x30] sm:$0xff] }
 0x23a   :  { %v741_v26 = vmax.f32 %v703_v16, 0.0  ;;  %1711 = vmatprep.subr.bf16.mxu1 %v1710_v15 }
 0x23b   :  { %v742_v21 = vmax.f32 %v705_v17, 0.0  ;;  %v708_v5 = vpop.f32.mrb[30].mxu0  ;;  %v1221_v17 = vld [vmem:[%s2695_s9 + $0x38] sm:$0xff]  ;;  %1713 = vmatpush3.bf16.msra.mxu1 %v1710_v15 }
 0x23c   :  { %v709_v19 = vadd.f32 %v708_v5, %v2488_v63  ;;  %v710_v22 = vpop.f32.mrb[31].mxu0  ;;  %v1222_v5 = vld [vmem:[%s2695_s9 + $0x40] sm:$0xff] }
 0x23d   :  { %v711_v57 = vadd.f32 %v710_v22, %v2491_v29  ;;  %969 = vmatprep.mubr.f32.mxu1 %v742_v21  ;;  %v1714_v21 = vpack.c.bf16 %v1221_v17, %v1220_v58 }
 0x23e   :  { %970 = vmatmul.mubr.f32.gmra.mrb[28].mxu1 %v741_v26  ;;  %v743_v23 = vmax.f32 %v709_v19, 0.0  ;;  %v1223_v26 = vld [vmem:[%s2695_s9 + $0x48] sm:$0xff] }
 0x23f   :  { %v744_v41 = vmax.f32 %v711_v57, 0.0  ;;  %1715 = vmatprep.subr.bf16.mxu1 %v1714_v21  ;;  %v1718_v19 = vpack.c.bf16 %v1223_v26, %v1222_v5 }
 0x240   :  { %1717 = vmatpush3.bf16.msra.mxu1 %v1714_v21 }
 0x241   :  { %975 = vmatprep.mubr.f32.mxu1 %v744_v41  ;;  %1719 = vmatprep.subr.bf16.mxu1 %v1718_v19 }
 0x242   :  { %976 = vmatmul.mubr.f32.gmra.mrb[30].mxu1 %v743_v23 }
 0x244   :  { %1721 = vmatpush3.bf16.msra.mxu1 %v1718_v19 }
 0x267   :  { %v887_v63 = vpop.f32.mrb[0].mxu1 }
 0x268   :  { %v888_v32 = vadd.f32 %v887_v63, %v2529_v30  ;;  %v889_v29 = vpop.f32.mrb[1].mxu1 }
 0x269   :  { %v890_v9 = vadd.f32 %v889_v29, %v2532_v31  ;;  %v1225_v29 = vld [vmem:[%s2695_s9 + $0x58] sm:$0xff] }
 0x26a   :  { %v982_v34 = vmax.f32 %v888_v32, 0.0  ;;  %v1224_v32 = vld [vmem:[%s2695_s9 + $0x50] sm:$0xff] }
 0x26b   :  { %v983_v33 = vmax.f32 %v890_v9, 0.0  ;;  %v893_v4 = vpop.f32.mrb[2].mxu1  ;;  %v1722_v9 = vpack.c.bf16 %v1225_v29, %v1224_v32 }
 0x26c   :  { %v894_v35 = vadd.f32 %v893_v4, %v2529_v30  ;;  %v895_v7 = vpop.f32.mrb[3].mxu1 }
 0x26d   :  { %v896_v36 = vadd.f32 %v895_v7, %v2532_v31  ;;  %1117 = vmatprep.mubr.f32.mxu0 %v983_v33  ;;  %1723 = vmatprep.subr.bf16.mxu1 %v1722_v9  ;;  %v1227_v7 = vld [vmem:[%s2695_s9 + $0x68] sm:$0xff] }
 0x26e   :  { %1118 = vmatmul.mubr.f32.vlgmr.msra.gmra.mrb[32].mxu0 %v982_v34  ;;  %v984_v37 = vmax.f32 %v894_v35, 0.0  ;;  %1725 = vmatpush3.bf16.msra.mxu1 %v1722_v9  ;;  %v1226_v35 = vld [vmem:[%s2695_s9 + $0x60] sm:$0xff] }
 0x26f   :  { %v985_v20 = vmax.f32 %v896_v36, 0.0 }
 0x271   :  { %v899_v18 = vpop.f32.mrb[4].mxu1  ;;  %1122 = vmatprep.mubr.f32.mxu0 %v985_v20  ;;  %v1726_v20 = vpack.c.bf16 %v1227_v7, %v1226_v35 }
 0x272   :  { %v900_v38 = vadd.f32 %v899_v18, %v2529_v30  ;;  %v901_v39 = vpop.f32.mrb[5].mxu1  ;;  %1123 = vmatmul.mubr.f32.gmra.mrb[34].mxu0 %v984_v37 }
 0x273   :  { %v902_v40 = vadd.f32 %v901_v39, %v2532_v31  ;;  %1727 = vmatprep.subr.bf16.mxu1 %v1726_v20 }
 0x274   :  { %v986_v42 = vmax.f32 %v900_v38, 0.0  ;;  %1729 = vmatpush3.bf16.msra.mxu1 %v1726_v20 }
 0x275   :  { %v987_v1 = vmax.f32 %v902_v40, 0.0 }
 0x277   :  { %1127 = vmatprep.mubr.f32.mxu0 %v987_v1  ;;  %v1228_v1 = vld [vmem:[%s2695_s9 + $0x70] sm:$0xff] }
 0x278   :  { %1128 = vmatmul.mubr.f32.gmra.mrb[36].mxu0 %v986_v42  ;;  %v1229_v42 = vld [vmem:[%s2695_s9 + $0x78] sm:$0xff] }
 0x27a   :  { %v905_v43 = vpop.f32.mrb[6].mxu1 }
 0x27b   :  { %v906_v44 = vadd.f32 %v905_v43, %v2529_v30  ;;  %v907_v45 = vpop.f32.mrb[7].mxu1 }
 0x27c   :  { %v908_v46 = vadd.f32 %v907_v45, %v2532_v31 }
 0x27d   :  { %v988_v50 = vmax.f32 %v906_v44, 0.0  ;;  %v1730_v44 = vpack.c.bf16 %v1229_v42, %v1228_v1 }
 0x27e   :  { %v989_v47 = vmax.f32 %v908_v46, 0.0 }
 0x27f   :  { %1731 = vmatprep.subr.bf16.mxu1 %v1730_v44 }
 0x280   :  { %1132 = vmatprep.mubr.f32.mxu0 %v989_v47  ;;  %1733 = vmatpush3.bf16.msra.mxu1 %v1730_v44 }
 0x281   :  { %1133 = vmatmul.mubr.f32.gmra.mrb[38].mxu0 %v988_v50 }
 0x28a   :  { %v911_v51 = vpop.f32.mrb[8].mxu1 }
 0x28b   :  { %v912_v52 = vadd.f32 %v911_v51, %v2529_v30  ;;  %v913_v53 = vpop.f32.mrb[9].mxu1 }
 0x28c   :  { %v914_v54 = vadd.f32 %v913_v53, %v2532_v31 }
 0x28d   :  { %v990_v56 = vmax.f32 %v912_v52, 0.0 }
 0x28e   :  { %v991_v55 = vmax.f32 %v914_v54, 0.0 }
 0x290   :  { %1137 = vmatprep.mubr.f32.mxu0 %v991_v55 }
 0x291   :  { %1138 = vmatmul.mubr.f32.gmra.mrb[40].mxu0 %v990_v56 }
 0x299   :  { %v917_v14 = vpop.f32.mrb[10].mxu1 }
 0x29a   :  { %v918_v59 = vadd.f32 %v917_v14, %v2529_v30  ;;  %v919_v61 = vpop.f32.mrb[11].mxu1 }
 0x29b   :  { %v920_v27 = vadd.f32 %v919_v61, %v2532_v31 }
 0x29c   :  { %v992_v10 = vmax.f32 %v918_v59, 0.0 }
 0x29d   :  { %v993_v3 = vmax.f32 %v920_v27, 0.0  ;;  %v923_v6 = vpop.f32.mrb[12].mxu1 }
 0x29e   :  { %v924_v60 = vadd.f32 %v923_v6, %v2529_v30  ;;  %v925_v11 = vpop.f32.mrb[13].mxu1 }
 0x29f   :  { %v926_v13 = vadd.f32 %v925_v11, %v2532_v31  ;;  %1142 = vmatprep.mubr.f32.mxu0 %v993_v3 }
 0x2a0   :  { %1143 = vmatmul.mubr.f32.gmra.mrb[42].mxu0 %v992_v10  ;;  %v994_v16 = vmax.f32 %v924_v60, 0.0 }
 0x2a1   :  { %v995_v48 = vmax.f32 %v926_v13, 0.0 }
 0x2a3   :  { %1147 = vmatprep.mubr.f32.mxu0 %v995_v48 }
 0x2a4   :  { %1148 = vmatmul.mubr.f32.gmra.mrb[44].mxu0 %v994_v16 }
 0x2b2   :  { %v929_v22 = vpop.f32.mrb[14].mxu1 }
 0x2b3   :  { %v930_v57 = vadd.f32 %v929_v22, %v2529_v30  ;;  %v931_v41 = vpop.f32.mrb[15].mxu1 }
 0x2b4   :  { %v932_v23 = vadd.f32 %v931_v41, %v2532_v31  ;;  %v2617_v41 = vld [vmem:[%s2694_s8] ss:$0 sm:$0xff] }
 0x2b5   :  { %v996_v63 = vmax.f32 %v930_v57, 0.0 }
 0x2b6   :  { %v997_v24 = vmax.f32 %v932_v23, 0.0 }
 0x2b8   :  { %1152 = vmatprep.mubr.f32.mxu0 %v997_v24 }
 0x2b9   :  { %1153 = vmatmul.mubr.f32.gmra.mrb[46].mxu0 %v996_v63 }
 0x2c1   :  { %v935_v33 = vpop.f32.mrb[16].mxu1 }
 0x2c2   :  { %v936_v4 = vadd.f32 %v935_v33, %v2529_v30  ;;  %v937_v34 = vpop.f32.mrb[17].mxu1 }
 0x2c3   :  { %v938_v36 = vadd.f32 %v937_v34, %v2532_v31 }
 0x2c4   :  { %v998_v38 = vmax.f32 %v936_v4, 0.0 }
 0x2c5   :  { %v999_v37 = vmax.f32 %v938_v36, 0.0  ;;  %v941_v18 = vpop.f32.mrb[18].mxu1 }
 0x2c6   :  { %v942_v39 = vadd.f32 %v941_v18, %v2529_v30  ;;  %v943_v40 = vpop.f32.mrb[19].mxu1 }
 0x2c7   :  { %v944_v43 = vadd.f32 %v943_v40, %v2532_v31  ;;  %1157 = vmatprep.mubr.f32.mxu0 %v999_v37 }
 0x2c8   :  { %1158 = vmatmul.mubr.f32.gmra.mrb[48].mxu0 %v998_v38  ;;  %v1000_v46 = vmax.f32 %v942_v39, 0.0 }
 0x2c9   :  { %v1001_v45 = vmax.f32 %v944_v43, 0.0 }
 0x2cb   :  { %1162 = vmatprep.mubr.f32.mxu0 %v1001_v45 }
 0x2cc   :  { %1163 = vmatmul.mubr.f32.gmra.mrb[50].mxu0 %v1000_v46 }
 0x2da   :  { %v947_v47 = vpop.f32.mrb[20].mxu1 }
 0x2db   :  { %v948_v50 = vadd.f32 %v947_v47, %v2529_v30  ;;  %v949_v51 = vpop.f32.mrb[21].mxu1 }
 0x2dc   :  { %v950_v52 = vadd.f32 %v949_v51, %v2532_v31 }
 0x2dd   :  { %v1002_v54 = vmax.f32 %v948_v50, 0.0 }
 0x2de   :  { %v1003_v53 = vmax.f32 %v950_v52, 0.0 }
 0x2e0   :  { %1167 = vmatprep.mubr.f32.mxu0 %v1003_v53 }
 0x2e1   :  { %1168 = vmatmul.mubr.f32.gmra.mrb[52].mxu0 %v1002_v54 }
 0x2e9   :  { %v953_v55 = vpop.f32.mrb[22].mxu1 }
 0x2ea   :  { %v954_v56 = vadd.f32 %v953_v55, %v2529_v30  ;;  %v955_v14 = vpop.f32.mrb[23].mxu1 }
 0x2eb   :  { %v956_v59 = vadd.f32 %v955_v14, %v2532_v31 }
 0x2ec   :  { %v1004_v25 = vmax.f32 %v954_v56, 0.0 }
 0x2ed   :  { %v1005_v61 = vmax.f32 %v956_v59, 0.0  ;;  %v959_v27 = vpop.f32.mrb[24].mxu1 }
 0x2ee   :  { %v960_v62 = vadd.f32 %v959_v27, %v2529_v30  ;;  %v961_v28 = vpop.f32.mrb[25].mxu1 }
 0x2ef   :  { %v962_v3 = vadd.f32 %v961_v28, %v2532_v31  ;;  %1172 = vmatprep.mubr.f32.mxu0 %v1005_v61 }
 0x2f0   :  { %1173 = vmatmul.mubr.f32.gmra.mrb[54].mxu0 %v1004_v25  ;;  %v1006_v8 = vmax.f32 %v960_v62, 0.0 }
 0x2f1   :  { %v1007_v6 = vmax.f32 %v962_v3, 0.0 }
 0x2f3   :  { %1177 = vmatprep.mubr.f32.mxu0 %v1007_v6 }
 0x2f4   :  { %1178 = vmatmul.mubr.f32.gmra.mrb[56].mxu0 %v1006_v8 }
 0x302   :  { %v965_v49 = vpop.f32.mrb[26].mxu1 }
 0x303   :  { %v966_v10 = vadd.f32 %v965_v49, %v2529_v30  ;;  %v967_v60 = vpop.f32.mrb[27].mxu1 }
 0x304   :  { %v968_v11 = vadd.f32 %v967_v60, %v2532_v31 }
 0x305   :  { %v1008_v12 = vmax.f32 %v966_v10, 0.0 }
 0x306   :  { %v1009_v0 = vmax.f32 %v968_v11, 0.0 }
 0x308   :  { %1182 = vmatprep.mubr.f32.mxu0 %v1009_v0 }
 0x309   :  { %1183 = vmatmul.mubr.f32.gmra.mrb[58].mxu0 %v1008_v12 }
 0x311   :  { %v971_v2 = vpop.f32.mrb[28].mxu1 }
 0x312   :  { %v972_v13 = vadd.f32 %v971_v2, %v2529_v30  ;;  %v973_v48 = vpop.f32.mrb[29].mxu1 }
 0x313   :  { %v974_v15 = vadd.f32 %v973_v48, %v2532_v31 }
 0x314   :  { %v1010_v17 = vmax.f32 %v972_v13, 0.0 }
 0x315   :  { %v1011_v16 = vmax.f32 %v974_v15, 0.0  ;;  %v977_v58 = vpop.f32.mrb[30].mxu1 }
 0x316   :  { %v978_v21 = vadd.f32 %v977_v58, %v2529_v30  ;;  %v979_v5 = vpop.f32.mrb[31].mxu1 }
 0x317   :  { %v980_v26 = vadd.f32 %v979_v5, %v2532_v31  ;;  %1187 = vmatprep.mubr.f32.mxu0 %v1011_v16 }
 0x318   :  { %1188 = vmatmul.mubr.f32.gmra.mrb[60].mxu0 %v1010_v17  ;;  %v1012_v22 = vmax.f32 %v978_v21, 0.0 }
 0x319   :  { %v1013_v19 = vmax.f32 %v980_v26, 0.0 }
 0x31b   :  { %1192 = vmatprep.mubr.f32.mxu0 %v1013_v19 }
 0x31c   :  { %1193 = vmatmul.mubr.f32.gmra.mrb[62].mxu0 %v1012_v22 }
 0x341   :  { %v1438_v57 = vpop.f32.mrb[32].mxu0 }
 0x342   :  { %v1439_v23 = vpop.f32.mrb[33].mxu0 }
 0x343   :  { %v1440_v24 = vadd.f32 %v1439_v23, %v1438_v57 }
 0x345   :  { %v1120_v63 = vadd.f32 %v1440_v24, %v2617_v41  ;;  %v1441_v30 = vpop.f32.mrb[34].mxu0 }
 0x346   :  { %v1442_v32 = vpop.f32.mrb[35].mxu0 }
 0x347   :  { %v1198_v29 = vmax.f32 %v1120_v63, 0.0  ;;  %v1443_v31 = vadd.f32 %v1442_v32, %v1441_v30 }
 0x349   :  { %v1125_v9 = vadd.f32 %v1443_v31, %v2617_v41  ;;  %1550 = vmatprep.mubr.f32.mxu1 %v1198_v29 }
 0x34b   :  { %v1199_v33 = vmax.f32 %v1125_v9, 0.0  ;;  %v1444_v4 = vpop.f32.mrb[36].mxu0 }
 0x34c   :  { %v1445_v34 = vpop.f32.mrb[37].mxu0 }
 0x34d   :  { %v1446_v35 = vadd.f32 %v1445_v34, %v1444_v4  ;;  %1551 = vmatmul.mubr.f32.vlgmr.msra.gmra.mrb[32].mxu1 %v1199_v33 }
 0x34f   :  { %v1130_v7 = vadd.f32 %v1446_v35, %v2617_v41 }
 0x351   :  { %v1200_v36 = vmax.f32 %v1130_v7, 0.0 }
 0x353   :  { %1553 = vmatprep.mubr.f32.mxu1 %v1200_v36 }
 0x354   :  { %v1447_v20 = vpop.f32.mrb[38].mxu0 }
 0x355   :  { %v1448_v37 = vpop.f32.mrb[39].mxu0 }
 0x356   :  { %v1449_v18 = vadd.f32 %v1448_v37, %v1447_v20 }
 0x358   :  { %v1135_v38 = vadd.f32 %v1449_v18, %v2617_v41  ;;  %v1405_v18 = vld [vmem:[%s2696_s10] ss:$0 sm:$0xff] }
 0x35a   :  { %v1201_v39 = vmax.f32 %v1135_v38, 0.0 }
 0x35c   :  { %1554 = vmatmul.mubr.f32.gmra.mrb[34].mxu1 %v1201_v39 }
 0x364   :  { %v1450_v40 = vpop.f32.mrb[40].mxu0 }
 0x365   :  { %v1451_v1 = vpop.f32.mrb[41].mxu0 }
 0x366   :  { %v1452_v42 = vadd.f32 %v1451_v1, %v1450_v40 }
 0x368   :  { %v1140_v43 = vadd.f32 %v1452_v42, %v2617_v41 }
 0x36a   :  { %v1202_v44 = vmax.f32 %v1140_v43, 0.0 }
 0x36c   :  { %1556 = vmatprep.mubr.f32.mxu1 %v1202_v44 }
 0x373   :  { %v1453_v45 = vpop.f32.mrb[42].mxu0 }
 0x374   :  { %v1454_v46 = vpop.f32.mrb[43].mxu0 }
 0x375   :  { %v1455_v47 = vadd.f32 %v1454_v46, %v1453_v45 }
 0x377   :  { %v1145_v50 = vadd.f32 %v1455_v47, %v2617_v41  ;;  %v1456_v51 = vpop.f32.mrb[44].mxu0 }
 0x378   :  { %v1457_v52 = vpop.f32.mrb[45].mxu0 }
 0x379   :  { %v1203_v53 = vmax.f32 %v1145_v50, 0.0  ;;  %v1458_v54 = vadd.f32 %v1457_v52, %v1456_v51 }
 0x37b   :  { %v1150_v55 = vadd.f32 %v1458_v54, %v2617_v41  ;;  %1557 = vmatmul.mubr.f32.gmra.mrb[36].mxu1 %v1203_v53 }
 0x37d   :  { %v1204_v56 = vmax.f32 %v1150_v55, 0.0 }
 0x37f   :  { %1559 = vmatprep.mubr.f32.mxu1 %v1204_v56 }
 0x38c   :  { %v1459_v14 = vpop.f32.mrb[46].mxu0 }
 0x38d   :  { %v1460_v59 = vpop.f32.mrb[47].mxu0 }
 0x38e   :  { %v1461_v61 = vadd.f32 %v1460_v59, %v1459_v14 }
 0x390   :  { %v1155_v27 = vadd.f32 %v1461_v61, %v2617_v41 }
 0x392   :  { %v1205_v25 = vmax.f32 %v1155_v27, 0.0 }
 0x394   :  { %1560 = vmatmul.mubr.f32.gmra.mrb[38].mxu1 %v1205_v25 }
 0x39b   :  { %v1462_v62 = vpop.f32.mrb[48].mxu0 }
 0x39c   :  { %v1463_v28 = vpop.f32.mrb[49].mxu0 }
 0x39d   :  { %v1464_v3 = vadd.f32 %v1463_v28, %v1462_v62 }
 0x39f   :  { %v1160_v6 = vadd.f32 %v1464_v3, %v2617_v41  ;;  %v1465_v8 = vpop.f32.mrb[50].mxu0 }
 0x3a0   :  { %v1466_v49 = vpop.f32.mrb[51].mxu0 }
 0x3a1   :  { %v1206_v10 = vmax.f32 %v1160_v6, 0.0  ;;  %v1467_v60 = vadd.f32 %v1466_v49, %v1465_v8 }
 0x3a3   :  { %v1165_v11 = vadd.f32 %v1467_v60, %v2617_v41  ;;  %1562 = vmatprep.mubr.f32.mxu1 %v1206_v10 }
 0x3a5   :  { %v1207_v0 = vmax.f32 %v1165_v11, 0.0 }
 0x3a7   :  { %1563 = vmatmul.mubr.f32.gmra.mrb[40].mxu1 %v1207_v0 }
 0x3b4   :  { %v1468_v12 = vpop.f32.mrb[52].mxu0 }
 0x3b5   :  { %v1469_v2 = vpop.f32.mrb[53].mxu0 }
 0x3b6   :  { %v1470_v13 = vadd.f32 %v1469_v2, %v1468_v12 }
 0x3b8   :  { %v1170_v48 = vadd.f32 %v1470_v13, %v2617_v41 }
 0x3ba   :  { %v1208_v15 = vmax.f32 %v1170_v48, 0.0 }
 0x3bc   :  { %1565 = vmatprep.mubr.f32.mxu1 %v1208_v15 }
 0x3c3   :  { %v1471_v16 = vpop.f32.mrb[54].mxu0 }
 0x3c4   :  { %v1472_v58 = vpop.f32.mrb[55].mxu0 }
 0x3c5   :  { %v1473_v17 = vadd.f32 %v1472_v58, %v1471_v16 }
 0x3c7   :  { %v1175_v21 = vadd.f32 %v1473_v17, %v2617_v41  ;;  %v1474_v5 = vpop.f32.mrb[56].mxu0 }
 0x3c8   :  { %v1475_v26 = vpop.f32.mrb[57].mxu0 }
 0x3c9   :  { %v1209_v19 = vmax.f32 %v1175_v21, 0.0  ;;  %v1476_v22 = vadd.f32 %v1475_v26, %v1474_v5 }
 0x3cb   :  { %v1180_v57 = vadd.f32 %v1476_v22, %v2617_v41  ;;  %1566 = vmatmul.mubr.f32.gmra.mrb[42].mxu1 %v1209_v19 }
 0x3cd   :  { %v1210_v23 = vmax.f32 %v1180_v57, 0.0 }
 0x3cf   :  { %1568 = vmatprep.mubr.f32.mxu1 %v1210_v23 }
 0x3dc   :  { %v1477_v24 = vpop.f32.mrb[58].mxu0 }
 0x3dd   :  { %v1478_v63 = vpop.f32.mrb[59].mxu0 }
 0x3de   :  { %v1479_v30 = vadd.f32 %v1478_v63, %v1477_v24 }
 0x3e0   :  { %v1185_v32 = vadd.f32 %v1479_v30, %v2617_v41 }
 0x3e2   :  { %v1211_v29 = vmax.f32 %v1185_v32, 0.0 }
 0x3e4   :  { %1569 = vmatmul.mubr.f32.gmra.mrb[44].mxu1 %v1211_v29 }
 0x3eb   :  { %v1480_v31 = vpop.f32.mrb[60].mxu0 }
 0x3ec   :  { %v1481_v9 = vpop.f32.mrb[61].mxu0 }
 0x3ed   :  { %v1482_v33 = vadd.f32 %v1481_v9, %v1480_v31 }
 0x3ef   :  { %v1190_v4 = vadd.f32 %v1482_v33, %v2617_v41  ;;  %v1483_v34 = vpop.f32.mrb[62].mxu0 }
 0x3f0   :  { %v1484_v35 = vpop.f32.mrb[63].mxu0 }
 0x3f1   :  { %v1212_v7 = vmax.f32 %v1190_v4, 0.0  ;;  %v1485_v36 = vadd.f32 %v1484_v35, %v1483_v34 }
 0x3f3   :  { %v1195_v20 = vadd.f32 %v1485_v36, %v2617_v41  ;;  %1571 = vmatprep.mubr.f32.mxu1 %v1212_v7 }
 0x3f5   :  { %v1213_v37 = vmax.f32 %v1195_v20, 0.0 }
 0x3f7   :  { %1572 = vmatmul.mubr.f32.gmra.mrb[46].mxu1 %v1213_v37 }
 0x420   :  { %v1552_v38 = vpop.f32.mrb[32].mxu1 }
 0x421   :  { %v1309_v39 = vadd.f32 %v1552_v38, %v1405_v18  ;;  %v1303_v40 = vpop.f32.mrb[33].mxu1 }
 0x422   :  { %v1304_v1 = vadd.f32 %v1405_v18, %v1303_v40 }
 0x423   :  { %1383 = vst [vmem:[%s2697_s11 + $0x8] sm:$0xff] %v1309_v39 }
 0x424   :  { %1382 = vst [vmem:[%s2697_s11] sm:$0xff] %v1304_v1 }
 0x42f   :  { %v1555_v41 = vpop.f32.mrb[34].mxu1 }
 0x430   :  { %v1319_v42 = vadd.f32 %v1555_v41, %v1405_v18  ;;  %v1313_v43 = vpop.f32.mrb[35].mxu1 }
 0x431   :  { %v1314_v44 = vadd.f32 %v1405_v18, %v1313_v43 }
 0x432   :  { %1385 = vst [vmem:[%s2697_s11 + $0x18] sm:$0xff] %v1319_v42 }
 0x433   :  { %1384 = vst [vmem:[%s2697_s11 + $0x10] sm:$0xff] %v1314_v44 }
 0x44e   :  { %v1558_v45 = vpop.f32.mrb[36].mxu1 }
 0x44f   :  { %v1329_v46 = vadd.f32 %v1558_v45, %v1405_v18  ;;  %v1323_v47 = vpop.f32.mrb[37].mxu1 }
 0x450   :  { %v1324_v50 = vadd.f32 %v1405_v18, %v1323_v47 }
 0x451   :  { %1387 = vst [vmem:[%s2697_s11 + $0x28] sm:$0xff] %v1329_v46 }
 0x452   :  { %1386 = vst [vmem:[%s2697_s11 + $0x20] sm:$0xff] %v1324_v50 }
 0x467   :  { %v1561_v51 = vpop.f32.mrb[38].mxu1 }
 0x468   :  { %v1339_v52 = vadd.f32 %v1561_v51, %v1405_v18  ;;  %v1333_v53 = vpop.f32.mrb[39].mxu1 }
 0x469   :  { %v1334_v54 = vadd.f32 %v1405_v18, %v1333_v53 }
 0x46a   :  { %1389 = vst [vmem:[%s2697_s11 + $0x38] sm:$0xff] %v1339_v52 }
 0x46b   :  { %1388 = vst [vmem:[%s2697_s11 + $0x30] sm:$0xff] %v1334_v54 }
 0x47a   :  { %v1564_v55 = vpop.f32.mrb[40].mxu1 }
 0x47b   :  { %v1349_v56 = vadd.f32 %v1564_v55, %v1405_v18  ;;  %v1343_v14 = vpop.f32.mrb[41].mxu1 }
 0x47c   :  { %v1344_v59 = vadd.f32 %v1405_v18, %v1343_v14 }
 0x47d   :  { %1391 = vst [vmem:[%s2697_s11 + $0x48] sm:$0xff] %v1349_v56 }
 0x47e   :  { %1390 = vst [vmem:[%s2697_s11 + $0x40] sm:$0xff] %v1344_v59 }
 0x49e   :  { %v1567_v61 = vpop.f32.mrb[42].mxu1 }
 0x49f   :  { %v1359_v27 = vadd.f32 %v1567_v61, %v1405_v18  ;;  %v1353_v25 = vpop.f32.mrb[43].mxu1 }
 0x4a0   :  { %v1354_v62 = vadd.f32 %v1405_v18, %v1353_v25 }
 0x4a1   :  { %1393 = vst [vmem:[%s2697_s11 + $0x58] sm:$0xff] %v1359_v27 }
 0x4a2   :  { %1392 = vst [vmem:[%s2697_s11 + $0x50] sm:$0xff] %v1354_v62 }
 0x4b7   :  { %v1570_v28 = vpop.f32.mrb[44].mxu1 }
 0x4b8   :  { %v1369_v3 = vadd.f32 %v1570_v28, %v1405_v18  ;;  %v1363_v6 = vpop.f32.mrb[45].mxu1 }
 0x4b9   :  { %v1364_v8 = vadd.f32 %v1405_v18, %v1363_v6 }
 0x4ba   :  { %1395 = vst [vmem:[%s2697_s11 + $0x68] sm:$0xff] %v1369_v3 }
 0x4bb   :  { %1394 = vst [vmem:[%s2697_s11 + $0x60] sm:$0xff] %v1364_v8 }
 0x4ca   :  { %v1573_v49 = vpop.f32.mrb[46].mxu1 }
 0x4cb   :  { %v1379_v10 = vadd.f32 %v1573_v49, %v1405_v18  ;;  %v1373_v60 = vpop.f32.mrb[47].mxu1 }
 0x4cc   :  { %v1374_v11 = vadd.f32 %v1405_v18, %v1373_v60 }
 0x4cd   :  { %1397 = vst [vmem:[%s2697_s11 + $0x78] sm:$0xff] %v1379_v10 }
 0x4ce   :  { %1396 = vst [vmem:[%s2697_s11 + $0x70] sm:$0xff] %v1374_v11 }
 0x4cf   :  { %1402 = vsyncpa [#allocation3], 1 }

</bundles_post_ra>
